<compile_context>
chip_gen: v6e
topology: v6e:2x2x1
jax: 0.10.0
libtpu: 0.0.40
codegen_flags: <defaults>
</compile_context>

<pallas_src>
import jax
import jax.numpy as jnp
from jax.experimental import pallas as pl
from jax.experimental.pallas import tpu as pltpu

BN_EPS = 1e-5
_VMEM_LIMIT_BYTES = 48 * 1024 * 1024   # leaves headroom on v7x (64 MiB VMEM)


def _pick_tile(total, target, multiple):
    """Largest divisor of `total` that is <= target and a multiple of `multiple`.
    Falls back to the full dimension (always a legal block) if none exists."""
    if total <= target:
        return total
    t = min(target, total)
    t -= t % multiple
    while t >= multiple:
        if total % t == 0:
            return t
        t -= multiple
    return total


# ------------------------------ Pallas kernels -------------------------------
def _pool_stats_kernel(x_ref, sum_ref, sumsq_ref):
    """Pass 1: per-(sample, channel) sum and sum-of-squares over spatial dims.

    x_ref: (tn, tc, thw) feature-map tile; outputs: (tn, tc) f32 accumulators.
    Grid = (N tiles, C tiles, HW tiles); HW is the reduction axis (last,
    'arbitrary'), outputs stay resident across it.
    """
    @pl.when(pl.program_id(2) == 0)
    def _():
        sum_ref[...] = jnp.zeros_like(sum_ref)
        sumsq_ref[...] = jnp.zeros_like(sumsq_ref)

    x = x_ref[...].astype(jnp.float32)          # (tn, tc, thw)
    sum_ref[...] += jnp.sum(x, axis=2)
    sumsq_ref[...] += jnp.sum(x * x, axis=2)


def _bn_apply_kernel(x_ref, scale_ref, shift_ref, o_ref):
    """Pass 2: y = x * scale + shift (BN folded into per-channel scale/shift)."""
    x = x_ref[...].astype(jnp.float32)          # (tn, tc, thw)
    scale = scale_ref[...]                      # (tc, 1)
    shift = shift_ref[...]                      # (tc, 1)
    o_ref[...] = (x * scale[None, :, :] + shift[None, :, :]).astype(o_ref.dtype)


def _classifier_kernel(bn_ref, w_ref, cls_ref):
    """cls = bn_feat @ W^T for one tile of classes (lane-dense output)."""
    w = w_ref[...]                              # (t_nc, C)
    bn = bn_ref[...].astype(w.dtype)            # (N, C) -> MXU operand dtype
    cls_ref[...] = jax.lax.dot_general(
        bn, w, (((1,), (1,)), ((), ())),
        preferred_element_type=jnp.float32).astype(cls_ref.dtype)


# --------------------------------- wrapper ------------------------------------
def embedding_head_forward(features_nchw, params, training=True, *,
                           tile_n=8, tile_c=256, tile_hw=512, tile_nc=512):
    """Mirrors EmbeddingHead.forward.

    features_nchw: (N, C, H, W), f32 or bf16.
    params: 'bn_gamma', 'bn_beta', 'bn_running_mean', 'bn_running_var' (all (C,))
            and 'cls_weight' (num_classes, C) (f32 or bf16).
    """
    N, C, H, W = features_nchw.shape
    HW = H * W
    x3 = features_nchw.reshape(N, C, HW)        # free reshape, no transpose

    gamma = params["bn_gamma"].astype(jnp.float32)
    beta = params["bn_beta"].astype(jnp.float32)
    rmean = params["bn_running_mean"].astype(jnp.float32)
    rvar = params["bn_running_var"].astype(jnp.float32)
    w = params["cls_weight"]                    # (num_classes, C)
    num_classes = w.shape[0]

    # Tile picks honor the (8, 128) block constraints:
    #  - t_n is the 2nd-to-last dim of the (N, C) stats outputs -> mult of 8 / full
    #  - t_c is the lane dim of the (N, C) outputs             -> mult of 128 / full
    #  - t_hw is the lane dim of the feature-map blocks        -> mult of 128 / full
    t_n = _pick_tile(N, tile_n, 8)
    t_c = _pick_tile(C, tile_c, 128)
    t_hw = _pick_tile(HW, tile_hw, 128)
    gn, gc, ghw = N // t_n, C // t_c, HW // t_hw

    # ---- pass 1: pooling + batch statistics (sum / sum-of-squares) ----
    # (sum-of-squares is only needed in training; it is one extra fused
    #  multiply-add per element on a mem-bound pass, so one kernel serves both.)
    sum_x, sumsq = pl.pallas_call(
        _pool_stats_kernel,
        out_shape=(jax.ShapeDtypeStruct((N, C), jnp.float32),
                   jax.ShapeDtypeStruct((N, C), jnp.float32)),
        grid=(gn, gc, ghw),
        in_specs=[pl.BlockSpec((t_n, t_c, t_hw), lambda i, j, k: (i, j, k))],
        out_specs=(pl.BlockSpec((t_n, t_c), lambda i, j, k: (i, j)),
                   pl.BlockSpec((t_n, t_c), lambda i, j, k: (i, j))),
        compiler_params=pltpu.CompilerParams(
            dimension_semantics=("parallel", "parallel", "arbitrary"),
            vmem_limit_bytes=_VMEM_LIMIT_BYTES),
    )(x3)

    gf = sum_x * (1.0 / HW)                     # (N, C) FastGlobalAvgPool2d

    # ---- per-channel finalize (tiny (N,C)/(C,) math, done in the wrapper) ----
    if training:
        inv_nhw = 1.0 / (N * HW)
        mu_l = jnp.sum(sum_x, axis=0) * inv_nhw
        var_l = jnp.maximum(jnp.sum(sumsq, axis=0) * inv_nhw - mu_l * mu_l, 0.0)
        scale_l = gamma * jax.lax.rsqrt(var_l + BN_EPS)
        shift_l = beta - mu_l * scale_l

        mu_g = jnp.mean(gf, axis=0)
        var_g = jnp.maximum(jnp.mean(gf * gf, axis=0) - mu_g * mu_g, 0.0)
        scale_g = gamma * jax.lax.rsqrt(var_g + BN_EPS)
        shift_g = beta - mu_g * scale_g
        # TODO(synk): PyTorch BatchNorm also updates running_mean/running_var
        # (momentum EMA, unbiased var) in-place during training; that module-
        # state side effect is left to the caller.
    else:
        scale_l = scale_g = gamma * jax.lax.rsqrt(rvar + BN_EPS)
        shift_l = shift_g = beta - rmean * scale_l

    # ---- pass 2: BN over the full feature map (elementwise, fully parallel) ----
    local3 = pl.pallas_call(
        _bn_apply_kernel,
        out_shape=jax.ShapeDtypeStruct((N, C, HW), x3.dtype),
        grid=(gn, gc, ghw),
        in_specs=[pl.BlockSpec((t_n, t_c, t_hw), lambda i, j, k: (i, j, k)),
                  pl.BlockSpec((t_c, 1), lambda i, j, k: (j, 0)),
                  pl.BlockSpec((t_c, 1), lambda i, j, k: (j, 0))],
        out_specs=pl.BlockSpec((t_n, t_c, t_hw), lambda i, j, k: (i, j, k)),
        compiler_params=pltpu.CompilerParams(
            dimension_semantics=("parallel", "parallel", "parallel"),
            vmem_limit_bytes=_VMEM_LIMIT_BYTES),
    )(x3, scale_l.reshape(C, 1), shift_l.reshape(C, 1))
    local_feat_map = local3.reshape(N, C, H, W)     # free reshape back to NCHW

    # BN of the pooled feature: tiny (N, C) elementwise, negligible cost.
    bn_feat = gf * scale_g[None, :] + shift_g[None, :]

    if not training:
        # eval path of the PyTorch module: (bn_feat, local_feat_map);
        # classifier weight is never DMA'd.
        return bn_feat, local_feat_map

    # ---- classifier (training only), tiled over num_classes ----
    t_nc = _pick_tile(num_classes, tile_nc, 128)
    g_nc = num_classes // t_nc
    cls_out = pl.pallas_call(
        _classifier_kernel,
        out_shape=jax.ShapeDtypeStruct((N, num_classes), jnp.float32),
        grid=(g_nc,),
        in_specs=[pl.BlockSpec((N, C), lambda j: (0, 0)),
                  pl.BlockSpec((t_nc, C), lambda j: (j, 0))],
        out_specs=pl.BlockSpec((N, t_nc), lambda j: (0, j)),
        compiler_params=pltpu.CompilerParams(
            dimension_semantics=("parallel",),
            vmem_limit_bytes=_VMEM_LIMIT_BYTES),
    )(bn_feat, w)

    return {
        "cls_outputs": cls_out,
        "pred_class_logits": cls_out,   # F.linear(bn_feat, W) == classifier(bn_feat)
        "features": gf,                 # neck_feat == 'before'
        "bn_feat": bn_feat,
        "local_feat_map": local_feat_map,
    }


# ---------------------- pure-JAX reference (for sanity) ----------------------
def _reference(features_nchw, params, training=True):
    N, C, H, W = features_nchw.shape
    gamma = params["bn_gamma"].astype(jnp.float32)
    beta = params["bn_beta"].astype(jnp.float32)
    rmean = params["bn_running_mean"].astype(jnp.float32)
    rvar = params["bn_running_var"].astype(jnp.float32)
    w = params["cls_weight"].astype(jnp.float32)

    x = features_nchw.astype(jnp.float32)
    gf = jnp.mean(x, axis=(2, 3))                                        # (N, C)
    if training:
        mu_g = jnp.mean(gf, axis=0)
        var_g = jnp.mean((gf - mu_g) ** 2, axis=0)
        bn_feat = (gf - mu_g) * jax.lax.rsqrt(var_g + BN_EPS) * gamma + beta
        mu_l = jnp.mean(x, axis=(0, 2, 3))
        var_l = jnp.mean((x - mu_l[None, :, None, None]) ** 2, axis=(0, 2, 3))
        local = ((x - mu_l[None, :, None, None])
                 * jax.lax.rsqrt(var_l + BN_EPS)[None, :, None, None]
                 * gamma[None, :, None, None] + beta[None, :, None, None])
    else:
        scale = jax.lax.rsqrt(rvar + BN_EPS) * gamma
        bn_feat = (gf - rmean) * scale + beta
        local = ((x - rmean[None, :, None, None]) * scale[None, :, None, None]
                 + beta[None, :, None, None])
    cls = bn_feat @ w.T
    if not training:
        return bn_feat, local
    return {"cls_outputs": cls, "pred_class_logits": cls, "features": gf,
            "bn_feat": bn_feat, "local_feat_map": local}


if __name__ == "__main__":
    # Small synthetic config that still exercises every grid axis.
    N, C, H, W = 16, 256, 16, 16
    num_classes = 384

    key = jax.random.PRNGKey(0)
    k_x, k_gamma, k_w = jax.random.split(key, 3)

    features = jax.random.normal(k_x, (N, C, H, W), dtype=jnp.float32)
    params = {
        # weights_init_kaiming for BN: weight ~ N(1, 0.02), bias = 0 (frozen)
        "bn_gamma": 1.0 + 0.02 * jax.random.normal(k_gamma, (C,), dtype=jnp.float32),
        "bn_beta": jnp.zeros((C,), dtype=jnp.float32),
        "bn_running_mean": jnp.zeros((C,), dtype=jnp.float32),
        "bn_running_var": jnp.ones((C,), dtype=jnp.float32),
        # weights_init_classifier: weight ~ N(0, 0.001)
        "cls_weight": 0.001 * jax.random.normal(k_w, (num_classes, C), dtype=jnp.float32),
    }

    # --- training forward, small tiles -> multi-tile grids on N / C / HW / classes
    out = embedding_head_forward(features, params, training=True,
                                 tile_n=8, tile_c=128, tile_hw=128, tile_nc=128)
    jax.block_until_ready(out)
    ref = _reference(features, params, training=True)
    for k in out:
        assert jnp.allclose(out[k], ref[k], atol=2e-4, rtol=1e-3), f"mismatch in {k}"

    # --- eval forward (returns (bn_feat, local_feat_map), classifier skipped) ---
    bn_e, local_e = embedding_head_forward(features, params, training=False,
                                           tile_n=8, tile_c=128, tile_hw=128)
    jax.block_until_ready((bn_e, local_e))
    bn_r, local_r = _reference(features, params, training=False)
    assert jnp.allclose(bn_e, bn_r, atol=2e-4, rtol=1e-3)
    assert jnp.allclose(local_e, local_r, atol=2e-4, rtol=1e-3)

    # --- bf16 I/O smoke run (default tiles): bf16 feature map + bf16 weight,
    #     f32 accumulation inside the kernels.
    feats_bf = features.astype(jnp.bfloat16)
    params_bf = dict(params, cls_weight=params["cls_weight"].astype(jnp.bfloat16))
    out_bf = embedding_head_forward(feats_bf, params_bf, training=True)
    jax.block_until_ready(out_bf)
    ref_bf = _reference(feats_bf.astype(jnp.float32), params, training=True)
    assert out_bf["local_feat_map"].dtype == jnp.bfloat16
    assert jnp.allclose(out_bf["bn_feat"], ref_bf["bn_feat"], atol=5e-2, rtol=5e-2)
    assert jnp.allclose(out_bf["local_feat_map"].astype(jnp.float32),
                        ref_bf["local_feat_map"], atol=5e-2, rtol=5e-2)

    print("KERNEL_OK")
</pallas_src>

<mosaic_0001>
module attributes {stable_mosaic.version = 11 : i64} {
  func.func @_pool_stats_kernel(%arg0: i32, %arg1: i32, %arg2: i32, %arg3: memref<8x128x128xf32, #tpu.memory_space<vmem>>, %arg4: memref<8x128xf32, #tpu.memory_space<vmem>>, %arg5: memref<8x128xf32, #tpu.memory_space<vmem>>) attributes {dimension_semantics = [#tpu.dimension_semantics<parallel>, #tpu.dimension_semantics<parallel>, #tpu.dimension_semantics<arbitrary>], iteration_bounds = array<i64: 2, 2, 2>, scalar_prefetch = 0 : i64, scratch_operands = 0 : i64, tpu.core_type = #tpu.core_type<tc>, window_params = [{transform_indices = @transform_0, window_bounds = array<i64: 8, 128, 128>}, {transform_indices = @transform_1, window_bounds = array<i64: 8, 128>}, {transform_indices = @transform_2, window_bounds = array<i64: 8, 128>}]} {
    %c0_i32 = arith.constant 0 : i32
    %0 = arith.cmpi eq, %arg2, %c0_i32 : i32
    %1 = arith.extui %0 : i1 to i32
    %c0_i32_0 = arith.constant 0 : i32
    %2 = arith.cmpi ne, %1, %c0_i32_0 : i32
    scf.if %2 {
      %cst_12 = arith.constant 0.000000e+00 : f32
      %13 = vector.broadcast %cst_12 : f32 to vector<8x128xf32>
      %c0_13 = arith.constant 0 : index
      %c0_14 = arith.constant 0 : index
      %14 = vector.load %arg4[%c0_13, %c0_14] : memref<8x128xf32, #tpu.memory_space<vmem>>, vector<8x128xf32>
      tpu.vector_store %arg4[%c0_13, %c0_14], %13 {strides = array<i32>} : memref<8x128xf32, #tpu.memory_space<vmem>>, vector<8x128xf32>,
      %cst_15 = arith.constant 0.000000e+00 : f32
      %15 = vector.broadcast %cst_15 : f32 to vector<8x128xf32>
      %c0_16 = arith.constant 0 : index
      %c0_17 = arith.constant 0 : index
      %16 = vector.load %arg5[%c0_16, %c0_17] : memref<8x128xf32, #tpu.memory_space<vmem>>, vector<8x128xf32>
      tpu.vector_store %arg5[%c0_16, %c0_17], %15 {strides = array<i32>} : memref<8x128xf32, #tpu.memory_space<vmem>>, vector<8x128xf32>,
    } else {
    }
    %c0 = arith.constant 0 : index
    %c0_1 = arith.constant 0 : index
    %c0_2 = arith.constant 0 : index
    %3 = vector.load %arg3[%c0, %c0_1, %c0_2] : memref<8x128x128xf32, #tpu.memory_space<vmem>>, vector<8x128x128xf32>
    %c0_3 = arith.constant 0 : index
    %c0_4 = arith.constant 0 : index
    %4 = vector.load %arg4[%c0_3, %c0_4] : memref<8x128xf32, #tpu.memory_space<vmem>>, vector<8x128xf32>
    %cst = arith.constant dense<0.000000e+00> : vector<8x128xf32>
    %5 = vector.multi_reduction <add>, %3, %cst [2] : vector<8x128x128xf32> to vector<8x128xf32>
    %6 = arith.addf %4, %5 : vector<8x128xf32>
    %c0_5 = arith.constant 0 : index
    %c0_6 = arith.constant 0 : index
    %7 = vector.load %arg4[%c0_5, %c0_6] : memref<8x128xf32, #tpu.memory_space<vmem>>, vector<8x128xf32>
    tpu.vector_store %arg4[%c0_5, %c0_6], %6 {strides = array<i32>} : memref<8x128xf32, #tpu.memory_space<vmem>>, vector<8x128xf32>,
    %c0_7 = arith.constant 0 : index
    %c0_8 = arith.constant 0 : index
    %8 = vector.load %arg5[%c0_7, %c0_8] : memref<8x128xf32, #tpu.memory_space<vmem>>, vector<8x128xf32>
    %9 = arith.mulf %3, %3 : vector<8x128x128xf32>
    %cst_9 = arith.constant dense<0.000000e+00> : vector<8x128xf32>
    %10 = vector.multi_reduction <add>, %9, %cst_9 [2] : vector<8x128x128xf32> to vector<8x128xf32>
    %11 = arith.addf %8, %10 : vector<8x128xf32>
    %c0_10 = arith.constant 0 : index
    %c0_11 = arith.constant 0 : index
    %12 = vector.load %arg5[%c0_10, %c0_11] : memref<8x128xf32, #tpu.memory_space<vmem>>, vector<8x128xf32>
    tpu.vector_store %arg5[%c0_10, %c0_11], %11 {strides = array<i32>} : memref<8x128xf32, #tpu.memory_space<vmem>>, vector<8x128xf32>,
    return
  }
  func.func @transform_0(%arg0: i32, %arg1: i32, %arg2: i32) -> (i32, i32, i32) {
    %c0_i32 = arith.constant 0 : i32
    return %arg0, %arg1, %arg2 : i32, i32, i32
  }
  func.func @transform_1(%arg0: i32, %arg1: i32, %arg2: i32) -> (i32, i32) {
    %c0_i32 = arith.constant 0 : i32
    return %arg0, %arg1 : i32, i32
  }
  func.func @transform_2(%arg0: i32, %arg1: i32, %arg2: i32) -> (i32, i32) {
    %c0_i32 = arith.constant 0 : i32
    return %arg0, %arg1 : i32, i32
  }
}

</mosaic_0001>

<bundles_post_ra>
// kernel: tpu_custom_call.1
= control target key start
LH: loop header
LB: loop body
LE: loop exit
PB: predicated region body
PF: predicated region fallthrough
CT: control target
= control target key end

     0   :  { %8 = vsyncpa [#allocation3], 0  ;;  %s4475_s0 = inlined_call_operand.hbm [shape: f32[16,256,256], index: 0, kind: input, shape index: {}]   ;;  %s4476_s1 = inlined_call_operand.hbm [shape: f32[16,256], index: 1, kind: output, shape index: {0}]   ;;  %s4477_s2 = inlined_call_operand.hbm [shape: f32[16,256], index: 2, kind: output, shape index: {1}]  }
   0x1   :  { %10 = vsyncpa [#allocation3 + $0x1], 0 }
   0x2   :  { %11 = vsyncpa [#allocation4], 0 }
   0x3   :  { %13 = vsyncpa [#allocation4 + $0x1], 0 }
   0x4   :  { %14 = vsyncpa [#allocation7], 0 }
   0x5   :  { %16 = vsyncpa [#allocation7 + $0x1], 0  ;;  %s3219_s9 = smov 0   ;;  %s3221_s10 = smov 0  }
   0x6   :  { %s3223_s11 = smov 0   ;;  %s3225_s12 = smov 0  }
   0x7   :  { %s3227_s13 = smov 0   ;;  %s3229_s14 = smov 0  }
   0x8   :  { %s3231_s15 = smov 0   ;;  %s3233_s16 = smov 0  }
   0x9   :  { %s3235_s17 = smov 0   ;;  %s3237_s18 = smov 0  }
   0xa   :  { %s3239_s19 = smov 0   ;;  %s3241_s20 = smov 0  }
   0xb   :  { %s3243_s21 = smov 0  }
   0xc LB: > { %4491 = sst [smem:[#allocation14_spill]] %s3152_s11  ;;  %s2750_s22 = sadd.s32 4294967295, %s3192_s21   ;;  %s3192_s21 = sphi %s3243_s21, %s22_s21   ;;  %s3188_s20 = sphi %s3241_s20, %s4524_s20   ;;  %s3184_s19 = sphi %s3239_s19, %s4523_s19   ;;  %s3180_s18 = sphi %s3237_s18, %s4531_s18   ;;  %s3176_s17 = sphi %s3235_s17, %s4521_s17   ;;  %s3172_s16 = sphi %s3233_s16, %s4520_s16   ;;  %s3168_s15 = sphi %s3231_s15, %s4530_s15   ;;  %s3164_s14 = sphi %s3229_s14, %s4529_s14   ;;  %s3160_s13 = sphi %s3227_s13, %s4528_s13   ;;  %s3156_s12 = sphi %s3225_s12, %s4527_s12   ;;  %s3152_s11 = sphi %s3223_s11, %s4518_s11   ;;  %s3148_s10 = sphi %s3221_s10, %s4526_s10   ;;  %s3144_s9 = sphi %s3219_s9, %s4525_s9  }
   0xd   : > { %4492 = sst [smem:[#allocation15_spill]] %s3184_s19  ;;  %s2751_s23 = sadd.s32 4294967294, %s3192_s21  }
   0xe   : > { %4493 = sst [smem:[#allocation16_spill]] %s3188_s20  ;;  %s34_s24 = sadd.s32 1, %s3180_s18 }
   0xf   : > { %p35_p0 = scmp.ge.s32.totalorder %s34_s24, 2  ;;  %s37_s25 = sadd.s32 1, %s3184_s19 }
  0x10   : > { %s41_s26 = sadd.s32 1, %s3188_s20  ;;  %p59_p1 = scmp.ne.s32.totalorder %s3164_s14, %s3160_s13 }
  0x11   : > { %s4533_s24 = smov (%p35_p0, %s34_s24), 0  ;;  %s4535_s25 = smov (!%p35_p0, %s37_s25), %s3184_s19 }
  0x12   : > { %4494 = sst [smem:[#allocation17_spill]] %s4533_s24  ;;  %s52_s27 = sadd.s32 1, %s3164_s14 }
  0x13   : > { %p60_p2 = scmp.eq.s32.totalorder %s3192_s21, 0  ;;  %p39_p3 = scmp.ge.s32.totalorder %s4535_s25, 2 }
  0x14   : > { %p65_p4 = scmp.ne.s32.totalorder %s3160_s13, %s3156_s12  ;;  %p66_p6 = scmp.eq.s32.totalorder %s2750_s22, 0 }
  0x15   : > { %p3295_p5 = por %p60_p2, %p59_p1  ;;  %s4537_s25 = smov (%p39_p3, %s4535_s25), 0 }
  0x16   : > { %4496 = sst [smem:[#allocation18_spill]] %s4537_s25  ;;  %s4539_s26 = smov (!%p39_p3, %s41_s26), %s3188_s20 }
  0x17   : > { %s48_s29 = ssub.s32 %s3180_s18, %s4533_s24  ;;  %p3304_p7 = por %p66_p6, %p65_p4 }
  0x18   : > { %p43_p8 = scmp.ge.s32.totalorder %s4539_s26, 2  ;;  %s46_s3 = ssub.s32 %s3184_s19, %s4537_s25 }
  0x19   : > { %p90_p9 = scmp.ne.s32.totalorder %s3152_s11, %s3148_s10  ;;  %p91_p10 = scmp.eq.s32.totalorder %s2750_s22, 7 }
  0x1a   : > { %s4541_s26 = smov (%p43_p8, %s4539_s26), 0  ;;  %p96_p12 = scmp.ne.s32.totalorder %s3148_s10, %s3144_s9 }
  0x1b   : > { %4498 = sst [smem:[#allocation19_spill]] %s4541_s26  ;;  %p3314_p11 = por %p91_p10, %p90_p9 }
  0x1c   : > { %s45_s5 = ssub.s32 %s3188_s20, %s4541_s26  ;;  %p97_p13 = scmp.eq.s32.totalorder %s2751_s23, 7 }
  0x1d   : > { %s47_s6 = sor.u32 %s46_s3, %s45_s5  ;;  %s80_s7 = sadd.s32 1, %s3152_s11 }
  0x1e   : > { %s49_s8 = sor.u32 %s48_s29, %s47_s6  ;;  %p78_p0 = scmp.eq.s32.totalorder %s47_s6, 0 }
  0x1f   : > { %p50_p1 = scmp.eq.s32.totalorder %s49_s8, 0  ;;  %p3323_p2 = por %p97_p13, %p96_p12 }
  0x20   : > { %s3328_s22 = scalar_select %p78_p0, %s3152_s11, %s80_s7  }
  0x21   : > { %s3331_s25 = scalar_select %p50_p1, %s3164_s14, %s52_s27  }
  0x22   : > { %4501 = sst [smem:[#allocation20_spill]] %s3328_s22  ;;  %p2753_p3 = scmp.ge.s32.totalorder %s3192_s21, 8 }
  0x23   : > { %4502 = sst [smem:[#allocation21_spill]] %s3331_s25 }
  0x24   : > { %141 = sbr.rel (%p2753_p3) target bundleno = 58 (0x3a), region = 16 }
  0x29   : > { %s145_s23 = sand.u32 1, %s3164_s14   ;;  %s2775_s29 = sshll.u32 %s3184_s19, 5 }
  0x2a   : > { %s2754_s3 = sshll.u32 %s145_s23, 10  ;;  %s156_s5 = sadd.s32 %s3180_s18, %s2775_s29 }
  0x2b   : > { %s2776_s6 = sshll.u32 %s3188_s20, 9  ;;  %s149_s27 = scalar_lea.vmem [#allocation2], %s2754_s3 }
  0x2c   : > { %s158_s7 = sadd.s32 %s2776_s6, %s156_s5  ;;  %s173_s8 = sshll.u32 %s149_s27, 4  ;;  %s174_s8 = int_to_ptr.vmem [resolvable:$true] %s173_s8 }
  0x2d   : > { %s2759_s26 = sshll.u32 %s158_s7, 7  ;;  %s3194_s24 = smov 8192  }
  0x2e   : > { %2778 = sst [smem:[#allocation9]] (%p3295_p5), %s3194_s24  ;;  %s3195_s11 = smov 2048  }
  0x2f   : > { %s2777_s25 = scalar_select %p3295_p5, [#allocation0], [#allocation10] }
  0x30   : > { %2779 = sst [smem:[#allocation9 + $0x1]] (%p3295_p5), %s3195_s11  ;;  %s3196_s19 = smov 16  }
  0x31   : > { %s165_s22 = sld [smem:[%s2777_s25]]   ;;  %s3197_s29 = smov 256  }
  0x32   : > { %2780 = sst [smem:[#allocation9 + $0x2]] (%p3295_p5), %s3196_s19  ;;  %s160_s6 = scalar_lea.hbm %s4475_s0, %s2759_s26 }
  0x33   : > { %2781 = sst [smem:[#allocation9 + $0x3]] (%p3295_p5), %s3197_s29  ;;  %s3198_s7 = smov 128  }
  0x34   : > { %2782 = sst [smem:[#allocation9 + $0x4]] (%p3295_p5), %s3198_s7  ;;  %s3199_s24 = smov 8  }
  0x35   : > { %2783 = sst [smem:[#allocation9 + $0x5]] (%p3295_p5), %s3199_s24  ;;  %s146_s11 = scalar_lea.sflag [#allocation3], %s145_s23 }
  0x36   : > { %s3200_s20 = smov 131072  }
  0x37   : > { %s2760_s25 = sshll.u32 %s165_s22, 26 }
  0x38   : > { %s2761_s27 = sadd.s32 134217728, %s2760_s25 }
  0x39   : > { %2784 = dma.general (%p3295_p5), %s160_s6, 16384, %s174_s8, %s146_s11, %s3200_s20, [#allocation9], %s2761_s27, 0  }
  0x3a PF: > { %p2762_p4 = scmp.ge.s32.totalorder %s3192_s21, 1  ;;  %p194_p6 = scmp.lt.s32.totalorder %s3192_s21, 9 }
  0x3c   : > { %p195_p8 = pnand %p2762_p4, %p194_p6 }
  0x3d   : > { %s200_s19 = sand.u32 (!%p195_p8), 1, %s3160_s13  }
  0x3e   : > { %198 = sbr.rel (%p195_p8) target bundleno = 753 (0x2f1), region = 24  ;;  %s2763_s26 = sshll.u32 (!%p195_p8), %s200_s19, 10 }
  0x3f   : > { %s201_s29 = scalar_lea.sflag (!%p195_p8), [#allocation3], %s200_s19  ;;  %s3360_s3 = scalar_lea.vmem (!%p195_p8), [#allocation2], %s2763_s26 }
  0x43   : > { %3131 = dma.done.wait (%p3304_p7), %s201_s29, 16384  }
  0x44   : > { %3133 = vsyncadd (%p3304_p7), %s201_s29, 4294950912  ;;  %s3367_s20 = sand.u32 1, %s3148_s10   ;;  %p2766_p5 = scmp.ne.s32.totalorder %s3168_s15, 0 }
  0x45   : > { %s2764_s28 = sshll.u32 %s3367_s20, 3 }
  0x46   : > { %s3370_s22 = scalar_lea.vmem [#allocation5], %s2764_s28  ;;  %s3372_s23 = scalar_lea.vmem [#allocation6], %s2764_s28 }
  0x47   : > { %235 = sbr.rel (%p2766_p5) target bundleno = 78 (0x4e), region = 32 }
  0x4c   : > { %v3201_v0 = vmov 0.0  }
  0x4d   : > { %236 = vst [vmem:[%s3370_s22] sm:$0xff] %v3201_v0  ;;  %237 = vst [vmem:[%s3372_s23] sm:$0xff] %v3201_v0 }
  0x4e PF: > { %v3378_v1 = vld [vmem:[%s3360_s3 + $0x10] sm:$0xff]  ;;  %v3381_v2 = vld [vmem:[%s3360_s3] sm:$0xff]  ;;  %v3386_v3 = vld [vmem:[%s3360_s3 + $0x18] sm:$0xff]  ;;  %vm762_vm0 = vcmask 130112   ;;  %vm769_vm1 = vcmask 195712   ;;  %vm776_vm2 = vcmask 261312  }
  0x4f   : > { %371 = vadd.xlane.f32.xlu1 %v3378_v1  ;;  %367 = vadd.xlane.f32.xlu0 %v3381_v2  ;;  %v3389_v4 = vld [vmem:[%s3360_s3 + $0x8] sm:$0xff]  ;;  %v3397_v6 = vld [vmem:[%s3360_s3 + $0x20] sm:$0xff]  ;;  %v3402_v7 = vld [vmem:[%s3360_s3 + $0x38] sm:$0xff]  ;;  %vm783_vm3 = vcmask 326912   ;;  %vm790_vm4 = vcmask 392512   ;;  %vm797_vm5 = vcmask 458112  }
  0x50   : > { %v3394_v5 = vld [vmem:[%s3360_s3 + $0x28] sm:$0xff]  ;;  %v3405_v8 = vld [vmem:[%s3360_s3 + $0x30] sm:$0xff]  ;;  %v3413_v10 = vld [vmem:[%s3360_s3 + $0x40] sm:$0xff]  ;;  %vm804_vm6 = vcmask 523712   ;;  %vm811_vm7 = vcmask 589312   ;;  %vm818_vm8 = vcmask 654912  }
  0x51   : > { %v3410_v9 = vld [vmem:[%s3360_s3 + $0x48] sm:$0xff]  ;;  %v3418_v11 = vld [vmem:[%s3360_s3 + $0x58] sm:$0xff]  ;;  %v3421_v12 = vld [vmem:[%s3360_s3 + $0x50] sm:$0xff]  ;;  %vm825_vm9 = vcmask 720512   ;;  %vm4489_vm10 = vcmask 786112   ;;  %vm839_vm11 = vcmask 851712  }
  0x52   : > { %v251_v13 = vld [vmem:[%s3360_s3 + $0x68] sm:$0xff]  ;;  %v250_v14 = vld [vmem:[%s3360_s3 + $0x60] sm:$0xff]  ;;  %v253_v15 = vld [vmem:[%s3360_s3 + $0x78] sm:$0xff]  ;;  %vm846_vm12 = vcmask 917312   ;;  %vm853_vm13 = vcmask 982912   ;;  %vm860_vm14 = vcmask 1048512  }
  0x53   : > { %373 = vadd.xlane.f32.xlu1 %v3386_v3  ;;  %369 = vadd.xlane.f32.xlu0 %v3389_v4  ;;  %v252_v16 = vld [vmem:[%s3360_s3 + $0x70] sm:$0xff]  ;;  %v255_v17 = vld [vmem:[%s3360_s3 + $0x88] sm:$0xff]  ;;  %v254_v18 = vld [vmem:[%s3360_s3 + $0x80] sm:$0xff]  ;;  %vm4484_vm15 = vcmask 1041409   ;;  %s2769_s15 = sshll.u32 %s3176_s17, 1  ;;  %s2608_s8 = sshll.u32 %s3370_s22, 4  ;;  %s4218_s8 = int_to_ptr.vmem [resolvable:$true] %s2608_s8 }
  0x54   : > { %v257_v19 = vld [vmem:[%s3360_s3 + $0x98] sm:$0xff]  ;;  %v256_v20 = vld [vmem:[%s3360_s3 + $0x90] sm:$0xff]  ;;  %v259_v21 = vld [vmem:[%s3360_s3 + $0xa8] sm:$0xff]  ;;  %s4214_s30 = sadd.s32 %s3172_s16, %s2769_s15  ;;  %s2588_s16 = scalar_lea.sflag [#allocation4], %s3367_s20 }
  0x55   : > { %v258_v22 = vld [vmem:[%s3360_s3 + $0xa0] sm:$0xff]  ;;  %v261_v23 = vld [vmem:[%s3360_s3 + $0xb8] sm:$0xff]  ;;  %v260_v24 = vld [vmem:[%s3360_s3 + $0xb0] sm:$0xff]  ;;  %s2770_s5 = sshll.u32 %s4214_s30, 7  ;;  %s3026_s24 = scalar_lea.vmem %s4218_s8, 128 }
  0x56   : > { %v263_v25 = vld [vmem:[%s3360_s3 + $0xc8] sm:$0xff]  ;;  %v262_v26 = vld [vmem:[%s3360_s3 + $0xc0] sm:$0xff]  ;;  %v265_v27 = vld [vmem:[%s3360_s3 + $0xd8] sm:$0xff]  ;;  %s2606_s7 = scalar_lea.hbm %s4476_s1, %s2770_s5  ;;  %p3027_p7 = scmp.ne.s32.totalorder %s4218_s8, %s3026_s24 }
  0x57   : > { %377 = vadd.xlane.f32.xlu1 %v3394_v5  ;;  %375 = vadd.xlane.f32.xlu0 %v3397_v6  ;;  %v264_v28 = vld [vmem:[%s3360_s3 + $0xd0] sm:$0xff]  ;;  %v267_v29 = vld [vmem:[%s3360_s3 + $0xe8] sm:$0xff]  ;;  %v266_v30 = vld [vmem:[%s3360_s3 + $0xe0] sm:$0xff]  ;;  %s3202_s25 = smov [#allocation5]  }
  0x58   : > { %v269_v31 = vld [vmem:[%s3360_s3 + $0xf8] sm:$0xff]  ;;  %v268_v32 = vld [vmem:[%s3360_s3 + $0xf0] sm:$0xff]  ;;  %v271_v33 = vld [vmem:[%s3360_s3 + $0x108] sm:$0xff]  ;;  %p3028_p9 = pnand %p3027_p7, %p3314_p11  ;;  %s3030_s27 = sshll.u32 %s3202_s25, 4  ;;  %s3031_s27 = int_to_ptr.vmem [resolvable:$false] %s3030_s27 }
  0x59   : > { %v270_v34 = vld [vmem:[%s3360_s3 + $0x100] sm:$0xff]  ;;  %v273_v35 = vld [vmem:[%s3360_s3 + $0x118] sm:$0xff]  ;;  %v272_v36 = vld [vmem:[%s3360_s3 + $0x110] sm:$0xff]  ;;  %s3032_s11 = scalar_lea.vmem %s3031_s27, 256  ;;  %p3033_p12 = scmp.lt.s32.totalorder %s4218_s8, %s3031_s27 }
  0x5a   : > { %v275_v37 = vld [vmem:[%s3360_s3 + $0x128] sm:$0xff]  ;;  %v274_v38 = vld [vmem:[%s3360_s3 + $0x120] sm:$0xff]  ;;  %v277_v39 = vld [vmem:[%s3360_s3 + $0x138] sm:$0xff]  ;;  %p3029_p10 = pneg %p3028_p9  ;;  %p3034_p13 = scmp.lt.s32.totalorder %s3032_s11, %s3026_s24 }
  0x5b   : > { %381 = vadd.xlane.f32.xlu1 %v3402_v7  ;;  %379 = vadd.xlane.f32.xlu0 %v3405_v8  ;;  %v276_v40 = vld [vmem:[%s3360_s3 + $0x130] sm:$0xff]  ;;  %v279_v41 = vld [vmem:[%s3360_s3 + $0x148] sm:$0xff]  ;;  %v278_v42 = vld [vmem:[%s3360_s3 + $0x140] sm:$0xff] }
  0x5c   : > { %v281_v43 = vld [vmem:[%s3360_s3 + $0x158] sm:$0xff]  ;;  %v280_v44 = vld [vmem:[%s3360_s3 + $0x150] sm:$0xff]  ;;  %v283_v45 = vld [vmem:[%s3360_s3 + $0x168] sm:$0xff]  ;;  %p3035_p0 = por %p3034_p13, %p3033_p12 }
  0x5d   : > { %v282_v46 = vld [vmem:[%s3360_s3 + $0x160] sm:$0xff]  ;;  %v285_v47 = vld [vmem:[%s3360_s3 + $0x178] sm:$0xff]  ;;  %v284_v48 = vld [vmem:[%s3360_s3 + $0x170] sm:$0xff] }
  0x5e   : > { %v287_v49 = vld [vmem:[%s3360_s3 + $0x188] sm:$0xff]  ;;  %v286_v50 = vld [vmem:[%s3360_s3 + $0x180] sm:$0xff]  ;;  %v289_v51 = vld [vmem:[%s3360_s3 + $0x198] sm:$0xff]  ;;  %p3036_p1 = pnand %p3035_p0, %p3029_p10 }
  0x5f   : > { %385 = vadd.xlane.f32.xlu1 %v3410_v9  ;;  %383 = vadd.xlane.f32.xlu0 %v3413_v10  ;;  %v288_v52 = vld [vmem:[%s3360_s3 + $0x190] sm:$0xff]  ;;  %v291_v53 = vld [vmem:[%s3360_s3 + $0x1a8] sm:$0xff]  ;;  %v290_v54 = vld [vmem:[%s3360_s3 + $0x1a0] sm:$0xff] }
  0x60   : > { %v293_v55 = vld [vmem:[%s3360_s3 + $0x1b8] sm:$0xff]  ;;  %v292_v56 = vld [vmem:[%s3360_s3 + $0x1b0] sm:$0xff]  ;;  %v295_v57 = vld [vmem:[%s3360_s3 + $0x1c8] sm:$0xff] }
  0x61   : > { %v294_v58 = vld [vmem:[%s3360_s3 + $0x1c0] sm:$0xff]  ;;  %v297_v59 = vld [vmem:[%s3360_s3 + $0x1d8] sm:$0xff]  ;;  %v296_v60 = vld [vmem:[%s3360_s3 + $0x1d0] sm:$0xff] }
  0x62   : > { %v299_v61 = vld [vmem:[%s3360_s3 + $0x1e8] sm:$0xff]  ;;  %v298_v62 = vld [vmem:[%s3360_s3 + $0x1e0] sm:$0xff]  ;;  %v301_v63 = vld [vmem:[%s3360_s3 + $0x1f8] sm:$0xff] }
  0x63   : > { %389 = vadd.xlane.f32.xlu1 %v3418_v11  ;;  %387 = vadd.xlane.f32.xlu0 %v3421_v12  ;;  %v300_v0 = vld [vmem:[%s3360_s3 + $0x1f0] sm:$0xff] }
  0x67   : > { %393 = vadd.xlane.f32.xlu1 %v251_v13  ;;  %391 = vadd.xlane.f32.xlu0 %v250_v14  ;;  %v303_v13 = vld [vmem:[%s3360_s3 + $0x208] sm:$0xff]  ;;  %v302_v14 = vld [vmem:[%s3360_s3 + $0x200] sm:$0xff] }
  0x6b   : > { %397 = vadd.xlane.f32.xlu1 %v253_v15  ;;  %395 = vadd.xlane.f32.xlu0 %v252_v16  ;;  %v751_v15 = vlaneseq  ;;  %v305_v16 = vld [vmem:[%s3360_s3 + $0x218] sm:$0xff] }
  0x6f   : > { %401 = vadd.xlane.f32.xlu1 %v255_v17  ;;  %399 = vadd.xlane.f32.xlu0 %v254_v18  ;;  %v304_v17 = vld [vmem:[%s3360_s3 + $0x210] sm:$0xff]  ;;  %v3481_v18 = vand.u32 127, %v751_v15 }
  0x73   : > { %405 = vadd.xlane.f32.xlu1 %v257_v19  ;;  %403 = vadd.xlane.f32.xlu0 %v256_v20  ;;  %v307_v19 = vld [vmem:[%s3360_s3 + $0x228] sm:$0xff]  ;;  %v306_v20 = vld [vmem:[%s3360_s3 + $0x220] sm:$0xff] }
  0x77   : > { %409 = vadd.xlane.f32.xlu1 %v259_v21  ;;  %407 = vadd.xlane.f32.xlu0 %v258_v22  ;;  %v3485_v21 = vshrl.u32 %v751_v15, 7  ;;  %v771_v22 = vadd.s32 4294967272, %v3481_v18  ;;  %v827_v15 = vadd.s32 4294967208, %v3481_v18 }
  0x7b   : > { %413 = vadd.xlane.f32.xlu1 %v261_v23  ;;  %411 = vadd.xlane.f32.xlu0 %v260_v24  ;;  %v757_v23 = vadd.s32 4294967288, %v3481_v18  ;;  %v764_v24 = vadd.s32 4294967280, %v3481_v18 }
  0x7f   : > { %417 = vadd.xlane.f32.xlu1 %v263_v25  ;;  %415 = vadd.xlane.f32.xlu0 %v262_v26 }
  0x83   : > { %421 = vadd.xlane.f32.xlu1 %v265_v27  ;;  %419 = vadd.xlane.f32.xlu0 %v264_v28  ;;  %v309_v27 = vld [vmem:[%s3360_s3 + $0x238] sm:$0xff]  ;;  %v308_v28 = vld [vmem:[%s3360_s3 + $0x230] sm:$0xff] }
  0x87   : > { %425 = vadd.xlane.f32.xlu1 %v267_v29  ;;  %423 = vadd.xlane.f32.xlu0 %v266_v30  ;;  %v785_v29 = vadd.s32 4294967256, %v3481_v18  ;;  %v3495_v30 = vsub.s32 %v3481_v18, %v3485_v21 }
  0x8b   : > { %429 = vadd.xlane.f32.xlu1 %v269_v31  ;;  %427 = vadd.xlane.f32.xlu0 %v268_v32  ;;  %v3498_v31 = vsub.s32 %v771_v22, %v3485_v21  ;;  %v3501_v32 = vsub.s32 %v757_v23, %v3485_v21 }
  0x8f   : > { %433 = vadd.xlane.f32.xlu1 %v271_v33  ;;  %431 = vadd.xlane.f32.xlu0 %v270_v34  ;;  %v778_v33 = vadd.s32 4294967264, %v3481_v18  ;;  %v3505_v34 = vsub.s32 %v764_v24, %v3485_v21 }
  0x93   : > { %437 = vadd.xlane.f32.xlu1 %v273_v35  ;;  %435 = vadd.xlane.f32.xlu0 %v272_v36 }
  0x97   : > { %441 = vadd.xlane.f32.xlu1 %v275_v37  ;;  %439 = vadd.xlane.f32.xlu0 %v274_v38  ;;  %v311_v37 = vld [vmem:[%s3360_s3 + $0x248] sm:$0xff]  ;;  %v310_v38 = vld [vmem:[%s3360_s3 + $0x240] sm:$0xff] }
  0x9b   : > { %445 = vadd.xlane.f32.xlu1 %v277_v39  ;;  %443 = vadd.xlane.f32.xlu0 %v276_v40  ;;  %v3510_v39 = vsub.s32 %v785_v29, %v3485_v21  ;;  %v799_v40 = vadd.s32 4294967240, %v3481_v18  ;;  %v834_v29 = vadd.s32 4294967200, %v3481_v18 }
  0x9f   : > { %449 = vadd.xlane.f32.xlu1 %v279_v41  ;;  %447 = vadd.xlane.f32.xlu0 %v278_v42  ;;  %v792_v41 = vadd.s32 4294967248, %v3481_v18 }
  0xa3   : > { %453 = vadd.xlane.f32.xlu1 %v281_v43  ;;  %451 = vadd.xlane.f32.xlu0 %v280_v44 }
  0xa7   : > { %457 = vadd.xlane.f32.xlu1 %v283_v45  ;;  %455 = vadd.xlane.f32.xlu0 %v282_v46  ;;  %v3518_v45 = vsub.s32 %v778_v33, %v3485_v21 }
  0xab   : > { %461 = vadd.xlane.f32.xlu1 %v285_v47  ;;  %459 = vadd.xlane.f32.xlu0 %v284_v48 }
  0xaf   : > { %465 = vadd.xlane.f32.xlu1 %v287_v49  ;;  %463 = vadd.xlane.f32.xlu0 %v286_v50 }
  0xb3   : > { %469 = vadd.xlane.f32.xlu1 %v289_v51  ;;  %467 = vadd.xlane.f32.xlu0 %v288_v52  ;;  %v313_v51 = vld [vmem:[%s3360_s3 + $0x258] sm:$0xff]  ;;  %v312_v52 = vld [vmem:[%s3360_s3 + $0x250] sm:$0xff] }
  0xb7   : > { %473 = vadd.xlane.f32.xlu1 %v291_v53  ;;  %471 = vadd.xlane.f32.xlu0 %v290_v54  ;;  %v3526_v53 = vsub.s32 %v799_v40, %v3485_v21  ;;  %v3529_v54 = vsub.s32 %v792_v41, %v3485_v21 }
  0xbb   : > { %477 = vadd.xlane.f32.xlu1 %v293_v55  ;;  %475 = vadd.xlane.f32.xlu0 %v292_v56  ;;  %v813_v55 = vadd.s32 4294967224, %v3481_v18 }
  0xbf   : > { %481 = vadd.xlane.f32.xlu1 %v295_v57  ;;  %479 = vadd.xlane.f32.xlu0 %v294_v58 }
  0xc3   : > { %485 = vadd.xlane.f32.xlu1 %v297_v59  ;;  %483 = vadd.xlane.f32.xlu0 %v296_v60  ;;  %v806_v59 = vadd.s32 4294967232, %v3481_v18 }
  0xc7   : > { %489 = vadd.xlane.f32.xlu1 %v299_v61  ;;  %487 = vadd.xlane.f32.xlu0 %v298_v62 }
  0xcb   : > { %493 = vadd.xlane.f32.xlu1 %v301_v63  ;;  %491 = vadd.xlane.f32.xlu0 %v300_v0  ;;  %v315_v0 = vld [vmem:[%s3360_s3 + $0x268] sm:$0xff] }
  0xcf   : > { %497 = vadd.xlane.f32.xlu1 %v303_v13  ;;  %495 = vadd.xlane.f32.xlu0 %v302_v14  ;;  %v314_v13 = vld [vmem:[%s3360_s3 + $0x260] sm:$0xff]  ;;  %v3541_v14 = vsub.s32 %v813_v55, %v3485_v21 }
  0xd3   : > { %501 = vadd.xlane.f32.xlu1 %v305_v16  ;;  %499 = vadd.xlane.f32.xlu0 %v304_v17 }
  0xd7   : > { %505 = vadd.xlane.f32.xlu1 %v307_v19  ;;  %503 = vadd.xlane.f32.xlu0 %v306_v20  ;;  %v3547_v19 = vsub.s32 %v806_v59, %v3485_v21  ;;  %v820_v20 = vadd.s32 4294967216, %v3481_v18  ;;  %v320_v59 = vld [vmem:[%s3360_s3 + $0x290] sm:$0xff] }
  0xd8   : > { %v372_v25 = vpop.xlane.xlu1 %371  ;;  %v368_v26 = vpop.xlane.xlu0 %367 }
  0xd9   : > { %v756_v42 = vrot.slane %v368_v26, %v3495_v30  ;;  %v768_v46 = vrot.slane %v372_v25, %v3505_v34  ;;  %v317_v26 = vld [vmem:[%s3360_s3 + $0x278] sm:$0xff] }
  0xdb   : > { %509 = vadd.xlane.f32.xlu1 %v309_v27  ;;  %507 = vadd.xlane.f32.xlu0 %v308_v28  ;;  %v316_v27 = vld [vmem:[%s3360_s3 + $0x270] sm:$0xff]  ;;  %v841_v28 = vadd.s32 4294967192, %v3481_v18 }
  0xdc   : > { %v374_v35 = vpop.xlane.xlu1 %373  ;;  %v370_v36 = vpop.xlane.xlu0 %369 }
  0xdd   : > { %v775_v43 = vrot.slane %v374_v35, %v3498_v31  ;;  %v761_v44 = vrot.slane %v370_v36, %v3501_v32  ;;  %v3559_v36 = vsub.s32 %v827_v15, %v3485_v21 }
  0xdf   : > { %v763_v47 = vsel %vm762_vm0, %v761_v44, %v756_v42  ;;  %513 = vadd.xlane.f32.xlu1 %v311_v37  ;;  %511 = vadd.xlane.f32.xlu0 %v310_v38  ;;  %v3562_v37 = vsub.s32 %v820_v20, %v3485_v21  ;;  %v318_v44 = vld [vmem:[%s3360_s3 + $0x280] sm:$0xff] }
  0xe0   : > { %v770_v48 = vsel %vm769_vm1, %v768_v46, %v763_v47  ;;  %v378_v49 = vpop.xlane.xlu1 %377  ;;  %v376_v50 = vpop.xlane.xlu0 %375  ;;  %v3569_v46 = vsub.s32 %v841_v28, %v3485_v21  ;;  %v3572_v47 = vsub.s32 %v834_v29, %v3485_v21 }
  0xe1   : > { %v789_v56 = vrot.slane %v378_v49, %v3510_v39  ;;  %v777_v57 = vsel %vm776_vm2, %v775_v43, %v770_v48  ;;  %v782_v58 = vrot.slane %v376_v50, %v3518_v45  ;;  %v319_v43 = vld [vmem:[%s3360_s3 + $0x288] sm:$0xff]  ;;  %v855_v50 = vadd.s32 4294967176, %v3481_v18 }
  0xe3   : > { %v784_v60 = vsel %vm783_vm3, %v782_v58, %v777_v57  ;;  %517 = vadd.xlane.f32.xlu1 %v313_v51  ;;  %515 = vadd.xlane.f32.xlu0 %v312_v52  ;;  %v848_v51 = vadd.s32 4294967184, %v3481_v18  ;;  %v321_v58 = vld [vmem:[%s3360_s3 + $0x298] sm:$0xff]  ;;  %v3585_v18 = vsub.s32 %v855_v50, %v3485_v21 }
  0xe4   : > { %v382_v61 = vpop.xlane.xlu1 %381  ;;  %v791_v62 = vsel %vm790_vm4, %v789_v56, %v784_v60  ;;  %v380_v63 = vpop.xlane.xlu0 %379 }
  0xe5   : > { %v803_v16 = vrot.slane %v382_v61, %v3526_v53  ;;  %v796_v17 = vrot.slane %v380_v63, %v3529_v54 }
  0xe7   : > { %v798_v22 = vsel %vm797_vm5, %v796_v17, %v791_v62  ;;  %521 = vadd.xlane.f32.xlu1 %v315_v0  ;;  %519 = vadd.xlane.f32.xlu0 %v314_v13  ;;  %v3588_v62 = vsub.s32 %v848_v51, %v3485_v21  ;;  %v322_v17 = vld [vmem:[%s3360_s3 + $0x2a0] sm:$0xff]  ;;  %v329_v51 = vld [vmem:[%s3360_s3 + $0x2d8] sm:$0xff] }
  0xe8   : > { %v386_v23 = vpop.xlane.xlu1 %385  ;;  %v805_v24 = vsel %vm804_vm6, %v803_v16, %v798_v22  ;;  %v384_v25 = vpop.xlane.xlu0 %383  ;;  %v323_v16 = vld [vmem:[%s3360_s3 + $0x2a8] sm:$0xff] }
  0xe9   : > { %v817_v33 = vrot.slane %v386_v23, %v3541_v14  ;;  %v810_v35 = vrot.slane %v384_v25, %v3547_v19 }
  0xeb   : > { %v812_v38 = vsel %vm811_vm7, %v810_v35, %v805_v24  ;;  %525 = vadd.xlane.f32.xlu1 %v317_v26  ;;  %523 = vadd.xlane.f32.xlu0 %v316_v27  ;;  %v325_v26 = vld [vmem:[%s3360_s3 + $0x2b8] sm:$0xff]  ;;  %v324_v27 = vld [vmem:[%s3360_s3 + $0x2b0] sm:$0xff] }
  0xec   : > { %v390_v40 = vpop.xlane.xlu1 %389  ;;  %v819_v41 = vsel %vm818_vm8, %v817_v33, %v812_v38  ;;  %v388_v42 = vpop.xlane.xlu0 %387 }
  0xed   : > { %v831_v48 = vrot.slane %v390_v40, %v3559_v36  ;;  %v824_v49 = vrot.slane %v388_v42, %v3562_v37  ;;  %v327_v40 = vld [vmem:[%s3360_s3 + $0x2c8] sm:$0xff] }
  0xef   : > { %v826_v52 = vsel %vm825_vm9, %v824_v49, %v819_v41  ;;  %529 = vadd.xlane.f32.xlu1 %v319_v43  ;;  %527 = vadd.xlane.f32.xlu0 %v318_v44  ;;  %v326_v41 = vld [vmem:[%s3360_s3 + $0x2c0] sm:$0xff] }
  0xf0   : > { %v394_v55 = vpop.xlane.xlu1 %393  ;;  %v833_v56 = vsel %vm4489_vm10, %v831_v48, %v826_v52  ;;  %v392_v57 = vpop.xlane.xlu0 %391  ;;  %v328_v52 = vld [vmem:[%s3360_s3 + $0x2d0] sm:$0xff] }
  0xf1   : > { %v845_v60 = vrot.slane %v394_v55, %v3569_v46  ;;  %v838_v61 = vrot.slane %v392_v57, %v3572_v47 }
  0xf3   : > { %v840_v63 = vsel %vm839_vm11, %v838_v61, %v833_v56  ;;  %533 = vadd.xlane.f32.xlu1 %v321_v58  ;;  %531 = vadd.xlane.f32.xlu0 %v320_v59  ;;  %v331_v61 = vld [vmem:[%s3360_s3 + $0x2e8] sm:$0xff] }
  0xf4   : > { %v398_v0 = vpop.xlane.xlu1 %397  ;;  %v847_v13 = vsel %vm846_vm12, %v845_v60, %v840_v63  ;;  %v396_v15 = vpop.xlane.xlu0 %395  ;;  %v330_v63 = vld [vmem:[%s3360_s3 + $0x2e0] sm:$0xff] }
  0xf5   : > { %v859_v20 = vrot.slane %v398_v0, %v3585_v18  ;;  %v852_v22 = vrot.slane %v396_v15, %v3588_v62 }
  0xf7   : > { %v854_v21 = vsel %vm853_vm13, %v852_v22, %v847_v13  ;;  %537 = vadd.xlane.f32.xlu1 %v323_v16  ;;  %535 = vadd.xlane.f32.xlu0 %v322_v17  ;;  %v333_v22 = vld [vmem:[%s3360_s3 + $0x2f8] sm:$0xff] }
  0xf8   : > { %v3598_v23 = vsel %vm860_vm14, %v859_v20, %v854_v21  ;;  %v402_v24 = vpop.xlane.xlu1 %401  ;;  %v400_v25 = vpop.xlane.xlu0 %399  ;;  %v332_v21 = vld [vmem:[%s3360_s3 + $0x2f0] sm:$0xff] }
  0xf9   : > { %v869_v28 = vrot.slane %v402_v24, %v3501_v32  ;;  %v865_v29 = vrot.slane %v400_v25, %v3495_v30 }
  0xfb   : > { %v870_v33 = vsel %vm762_vm0, %v869_v28, %v865_v29  ;;  %541 = vadd.xlane.f32.xlu1 %v325_v26  ;;  %539 = vadd.xlane.f32.xlu0 %v324_v27 }
  0xfc   : > { %v406_v35 = vpop.xlane.xlu1 %405  ;;  %v404_v38 = vpop.xlane.xlu0 %403 }
  0xfd   : > { %v879_v42 = vrot.slane %v406_v35, %v3498_v31  ;;  %v874_v43 = vrot.slane %v404_v38, %v3505_v34  ;;  %v334_v35 = vld [vmem:[%s3360_s3 + $0x300] sm:$0xff] }
  0xff   : > { %v875_v44 = vsel %vm769_vm1, %v874_v43, %v870_v33  ;;  %545 = vadd.xlane.f32.xlu1 %v327_v40  ;;  %543 = vadd.xlane.f32.xlu0 %v326_v41  ;;  %v335_v33 = vld [vmem:[%s3360_s3 + $0x308] sm:$0xff] }
 0x100   : > { %v410_v48 = vpop.xlane.xlu1 %409  ;;  %v880_v49 = vsel %vm776_vm2, %v879_v42, %v875_v44  ;;  %v408_v50 = vpop.xlane.xlu0 %407 }
 0x101   : > { %v889_v55 = vrot.slane %v410_v48, %v3510_v39  ;;  %v884_v56 = vrot.slane %v408_v50, %v3518_v45  ;;  %v337_v48 = vld [vmem:[%s3360_s3 + $0x318] sm:$0xff] }
 0x103   : > { %v885_v57 = vsel %vm783_vm3, %v884_v56, %v880_v49  ;;  %549 = vadd.xlane.f32.xlu1 %v329_v51  ;;  %547 = vadd.xlane.f32.xlu0 %v328_v52  ;;  %v336_v49 = vld [vmem:[%s3360_s3 + $0x310] sm:$0xff] }
 0x104   : > { %v414_v58 = vpop.xlane.xlu1 %413  ;;  %v890_v59 = vsel %vm790_vm4, %v889_v55, %v885_v57  ;;  %v412_v60 = vpop.xlane.xlu0 %411 }
 0x105   : > { %v899_v0 = vrot.slane %v414_v58, %v3526_v53  ;;  %v894_v13 = vrot.slane %v412_v60, %v3529_v54  ;;  %v339_v58 = vld [vmem:[%s3360_s3 + $0x328] sm:$0xff] }
 0x107   : > { %v895_v15 = vsel %vm797_vm5, %v894_v13, %v890_v59  ;;  %553 = vadd.xlane.f32.xlu1 %v331_v61  ;;  %551 = vadd.xlane.f32.xlu0 %v330_v63  ;;  %v338_v59 = vld [vmem:[%s3360_s3 + $0x320] sm:$0xff] }
 0x108   : > { %v418_v16 = vpop.xlane.xlu1 %417  ;;  %v900_v17 = vsel %vm804_vm6, %v899_v0, %v895_v15  ;;  %v416_v20 = vpop.xlane.xlu0 %415 }
 0x109   : > { %v909_v24 = vrot.slane %v418_v16, %v3541_v14  ;;  %v904_v25 = vrot.slane %v416_v20, %v3547_v19  ;;  %v341_v16 = vld [vmem:[%s3360_s3 + $0x338] sm:$0xff] }
 0x10b   : > { %v905_v26 = vsel %vm811_vm7, %v904_v25, %v900_v17  ;;  %557 = vadd.xlane.f32.xlu1 %v333_v22  ;;  %555 = vadd.xlane.f32.xlu0 %v332_v21  ;;  %v340_v17 = vld [vmem:[%s3360_s3 + $0x330] sm:$0xff] }
 0x10c   : > { %v422_v27 = vpop.xlane.xlu1 %421  ;;  %v910_v28 = vsel %vm818_vm8, %v909_v24, %v905_v26  ;;  %v420_v29 = vpop.xlane.xlu0 %419 }
 0x10d   : > { %v919_v38 = vrot.slane %v422_v27, %v3559_v36  ;;  %v914_v40 = vrot.slane %v420_v29, %v3562_v37  ;;  %v343_v27 = vld [vmem:[%s3360_s3 + $0x348] sm:$0xff] }
 0x10f   : > { %v915_v41 = vsel %vm825_vm9, %v914_v40, %v910_v28  ;;  %561 = vadd.xlane.f32.xlu1 %v335_v33  ;;  %559 = vadd.xlane.f32.xlu0 %v334_v35  ;;  %v342_v28 = vld [vmem:[%s3360_s3 + $0x340] sm:$0xff] }
 0x110   : > { %v426_v42 = vpop.xlane.xlu1 %425  ;;  %v920_v43 = vsel %vm4489_vm10, %v919_v38, %v915_v41  ;;  %v424_v44 = vpop.xlane.xlu0 %423  ;;  %v345_v41 = vld [vmem:[%s3360_s3 + $0x358] sm:$0xff] }
 0x111   : > { %v929_v50 = vrot.slane %v426_v42, %v3569_v46  ;;  %v924_v51 = vrot.slane %v424_v44, %v3572_v47  ;;  %v344_v42 = vld [vmem:[%s3360_s3 + $0x350] sm:$0xff] }
 0x113   : > { %v925_v52 = vsel %vm839_vm11, %v924_v51, %v920_v43  ;;  %565 = vadd.xlane.f32.xlu1 %v337_v48  ;;  %563 = vadd.xlane.f32.xlu0 %v336_v49 }
 0x114   : > { %v430_v55 = vpop.xlane.xlu1 %429  ;;  %v930_v56 = vsel %vm846_vm12, %v929_v50, %v925_v52  ;;  %v428_v57 = vpop.xlane.xlu0 %427  ;;  %v347_v52 = vld [vmem:[%s3360_s3 + $0x368] sm:$0xff] }
 0x115   : > { %v939_v60 = vrot.slane %v430_v55, %v3585_v18  ;;  %v934_v61 = vrot.slane %v428_v57, %v3588_v62  ;;  %v346_v55 = vld [vmem:[%s3360_s3 + $0x360] sm:$0xff] }
 0x117   : > { %v935_v63 = vsel %vm853_vm13, %v934_v61, %v930_v56  ;;  %569 = vadd.xlane.f32.xlu1 %v339_v58  ;;  %567 = vadd.xlane.f32.xlu0 %v338_v59 }
 0x118   : > { %v940_v0 = vsel %vm860_vm14, %v939_v60, %v935_v63  ;;  %v434_v13 = vpop.xlane.xlu1 %433  ;;  %v432_v15 = vpop.xlane.xlu0 %431  ;;  %v349_v63 = vld [vmem:[%s3360_s3 + $0x378] sm:$0xff] }
 0x119   : > { %v3651_v20 = vsel %vm4484_vm15, %v940_v0, %v3598_v23  ;;  %v948_v22 = vrot.slane %v434_v13, %v3501_v32  ;;  %v944_v21 = vrot.slane %v432_v15, %v3495_v30  ;;  %v348_v0 = vld [vmem:[%s3360_s3 + $0x370] sm:$0xff]  ;;  %vm4485_vm15 = vcmask 1042434  }
 0x11b   : > { %v949_v24 = vsel %vm762_vm0, %v948_v22, %v944_v21  ;;  %573 = vadd.xlane.f32.xlu1 %v341_v16  ;;  %571 = vadd.xlane.f32.xlu0 %v340_v17 }
 0x11c   : > { %v438_v25 = vpop.xlane.xlu1 %437  ;;  %v436_v26 = vpop.xlane.xlu0 %435 }
 0x11d   : > { %v958_v29 = vrot.slane %v438_v25, %v3498_v31  ;;  %v953_v33 = vrot.slane %v436_v26, %v3505_v34  ;;  %v350_v25 = vld [vmem:[%s3360_s3 + $0x380] sm:$0xff] }
 0x11f   : > { %v954_v23 = vsel %vm769_vm1, %v953_v33, %v949_v24  ;;  %577 = vadd.xlane.f32.xlu1 %v343_v27  ;;  %575 = vadd.xlane.f32.xlu0 %v342_v28  ;;  %v351_v24 = vld [vmem:[%s3360_s3 + $0x388] sm:$0xff] }
 0x120   : > { %v442_v35 = vpop.xlane.xlu1 %441  ;;  %v959_v38 = vsel %vm776_vm2, %v958_v29, %v954_v23  ;;  %v440_v40 = vpop.xlane.xlu0 %439 }
 0x121   : > { %v968_v43 = vrot.slane %v442_v35, %v3510_v39  ;;  %v963_v44 = vrot.slane %v440_v40, %v3518_v45  ;;  %v353_v35 = vld [vmem:[%s3360_s3 + $0x398] sm:$0xff] }
 0x123   : > { %v964_v48 = vsel %vm783_vm3, %v963_v44, %v959_v38  ;;  %581 = vadd.xlane.f32.xlu1 %v345_v41  ;;  %579 = vadd.xlane.f32.xlu0 %v344_v42  ;;  %v352_v38 = vld [vmem:[%s3360_s3 + $0x390] sm:$0xff] }
 0x124   : > { %v446_v49 = vpop.xlane.xlu1 %445  ;;  %v969_v50 = vsel %vm790_vm4, %v968_v43, %v964_v48  ;;  %v444_v51 = vpop.xlane.xlu0 %443 }
 0x125   : > { %v978_v56 = vrot.slane %v446_v49, %v3526_v53  ;;  %v973_v57 = vrot.slane %v444_v51, %v3529_v54  ;;  %v355_v49 = vld [vmem:[%s3360_s3 + $0x3a8] sm:$0xff] }
 0x127   : > { %v974_v58 = vsel %vm797_vm5, %v973_v57, %v969_v50  ;;  %585 = vadd.xlane.f32.xlu1 %v347_v52  ;;  %583 = vadd.xlane.f32.xlu0 %v346_v55  ;;  %v354_v50 = vld [vmem:[%s3360_s3 + $0x3a0] sm:$0xff] }
 0x128   : > { %v450_v59 = vpop.xlane.xlu1 %449  ;;  %v979_v60 = vsel %vm804_vm6, %v978_v56, %v974_v58  ;;  %v448_v61 = vpop.xlane.xlu0 %447 }
 0x129   : > { %v988_v13 = vrot.slane %v450_v59, %v3541_v14  ;;  %v983_v15 = vrot.slane %v448_v61, %v3547_v19  ;;  %v357_v59 = vld [vmem:[%s3360_s3 + $0x3b8] sm:$0xff] }
 0x12b   : > { %v984_v16 = vsel %vm811_vm7, %v983_v15, %v979_v60  ;;  %589 = vadd.xlane.f32.xlu1 %v349_v63  ;;  %587 = vadd.xlane.f32.xlu0 %v348_v0  ;;  %v356_v60 = vld [vmem:[%s3360_s3 + $0x3b0] sm:$0xff] }
 0x12c   : > { %v454_v17 = vpop.xlane.xlu1 %453  ;;  %v989_v22 = vsel %vm818_vm8, %v988_v13, %v984_v16  ;;  %v452_v21 = vpop.xlane.xlu0 %451 }
 0x12d   : > { %v998_v26 = vrot.slane %v454_v17, %v3559_v36  ;;  %v993_v27 = vrot.slane %v452_v21, %v3562_v37  ;;  %v359_v17 = vld [vmem:[%s3360_s3 + $0x3c8] sm:$0xff] }
 0x12f   : > { %v994_v28 = vsel %vm825_vm9, %v993_v27, %v989_v22  ;;  %593 = vadd.xlane.f32.xlu1 %v351_v24  ;;  %591 = vadd.xlane.f32.xlu0 %v350_v25  ;;  %v358_v22 = vld [vmem:[%s3360_s3 + $0x3c0] sm:$0xff] }
 0x130   : > { %v458_v29 = vpop.xlane.xlu1 %457  ;;  %v999_v33 = vsel %vm4489_vm10, %v998_v26, %v994_v28  ;;  %v456_v23 = vpop.xlane.xlu0 %455  ;;  %v361_v28 = vld [vmem:[%s3360_s3 + $0x3d8] sm:$0xff] }
 0x131   : > { %v1008_v40 = vrot.slane %v458_v29, %v3569_v46  ;;  %v1003_v41 = vrot.slane %v456_v23, %v3572_v47  ;;  %v360_v29 = vld [vmem:[%s3360_s3 + $0x3d0] sm:$0xff] }
 0x133   : > { %v1004_v42 = vsel %vm839_vm11, %v1003_v41, %v999_v33  ;;  %597 = vadd.xlane.f32.xlu1 %v353_v35  ;;  %595 = vadd.xlane.f32.xlu0 %v352_v38 }
 0x134   : > { %v462_v43 = vpop.xlane.xlu1 %461  ;;  %v1009_v44 = vsel %vm846_vm12, %v1008_v40, %v1004_v42  ;;  %v460_v48 = vpop.xlane.xlu0 %459  ;;  %v363_v42 = vld [vmem:[%s3360_s3 + $0x3e8] sm:$0xff] }
 0x135   : > { %v1018_v51 = vrot.slane %v462_v43, %v3585_v18  ;;  %v1013_v52 = vrot.slane %v460_v48, %v3588_v62  ;;  %v362_v43 = vld [vmem:[%s3360_s3 + $0x3e0] sm:$0xff] }
 0x137   : > { %v1014_v55 = vsel %vm853_vm13, %v1013_v52, %v1009_v44  ;;  %601 = vadd.xlane.f32.xlu1 %v355_v49  ;;  %599 = vadd.xlane.f32.xlu0 %v354_v50 }
 0x138   : > { %v1019_v56 = vsel %vm860_vm14, %v1018_v51, %v1014_v55  ;;  %v466_v57 = vpop.xlane.xlu1 %465  ;;  %v464_v58 = vpop.xlane.xlu0 %463  ;;  %v365_v55 = vld [vmem:[%s3360_s3 + $0x3f8] sm:$0xff] }
 0x139   : > { %v3702_v61 = vsel %vm4485_vm15, %v1019_v56, %v3651_v20  ;;  %v1027_v63 = vrot.slane %v466_v57, %v3501_v32  ;;  %v1023_v0 = vrot.slane %v464_v58, %v3495_v30  ;;  %v364_v56 = vld [vmem:[%s3360_s3 + $0x3f0] sm:$0xff]  ;;  %vm4486_vm15 = vcmask 1043459  }
 0x13b   : > { %v1028_v13 = vsel %vm762_vm0, %v1027_v63, %v1023_v0  ;;  %605 = vadd.xlane.f32.xlu1 %v357_v59  ;;  %603 = vadd.xlane.f32.xlu0 %v356_v60  ;;  %v1433_v59 = vmul.f32 %v3381_v2, %v3381_v2  ;;  %v1434_v60 = vmul.f32 %v3389_v4, %v3389_v4 }
 0x13c   : > { %v470_v15 = vpop.xlane.xlu1 %469  ;;  %v468_v16 = vpop.xlane.xlu0 %467  ;;  %v1436_v2 = vmul.f32 %v3386_v3, %v3386_v3 }
 0x13d   : > { %v1037_v21 = vrot.slane %v470_v15, %v3498_v31  ;;  %v1032_v24 = vrot.slane %v468_v16, %v3505_v34 }
 0x13f   : > { %v1033_v20 = vsel %vm769_vm1, %v1032_v24, %v1028_v13  ;;  %609 = vadd.xlane.f32.xlu1 %v359_v17  ;;  %607 = vadd.xlane.f32.xlu0 %v358_v22  ;;  %v1435_v22 = vmul.f32 %v3378_v1, %v3378_v1  ;;  %v1437_v1 = vmul.f32 %v3397_v6, %v3397_v6 }
 0x140   : > { %v474_v25 = vpop.xlane.xlu1 %473  ;;  %v1038_v26 = vsel %vm776_vm2, %v1037_v21, %v1033_v20  ;;  %v472_v27 = vpop.xlane.xlu0 %471 }
 0x141   : > { %v1047_v33 = vrot.slane %v474_v25, %v3510_v39  ;;  %v1042_v23 = vrot.slane %v472_v27, %v3518_v45  ;;  %v1438_v27 = vmul.f32 %v3394_v5, %v3394_v5  ;;  %v1439_v5 = vmul.f32 %v3405_v8, %v3405_v8 }
 0x142   : > { %v1441_v8 = vmul.f32 %v3413_v10, %v3413_v10 }
 0x143   : > { %v1043_v35 = vsel %vm783_vm3, %v1042_v23, %v1038_v26  ;;  %613 = vadd.xlane.f32.xlu1 %v361_v28  ;;  %611 = vadd.xlane.f32.xlu0 %v360_v29 }
 0x144   : > { %v478_v38 = vpop.xlane.xlu1 %477  ;;  %v1048_v40 = vsel %vm790_vm4, %v1047_v33, %v1043_v35  ;;  %v476_v41 = vpop.xlane.xlu0 %475 }
 0x145   : > { %v1057_v44 = vrot.slane %v478_v38, %v3526_v53  ;;  %v1052_v48 = vrot.slane %v476_v41, %v3529_v54  ;;  %v1440_v38 = vmul.f32 %v3402_v7, %v3402_v7  ;;  %v1442_v7 = vmul.f32 %v3410_v9, %v3410_v9 }
 0x146   : > { %v1443_v9 = vmul.f32 %v3421_v12, %v3421_v12 }
 0x147   : > { %v1053_v49 = vsel %vm797_vm5, %v1052_v48, %v1048_v40  ;;  %617 = vadd.xlane.f32.xlu1 %v363_v42  ;;  %615 = vadd.xlane.f32.xlu0 %v362_v43 }
 0x148   : > { %v482_v50 = vpop.xlane.xlu1 %481  ;;  %v1058_v51 = vsel %vm804_vm6, %v1057_v44, %v1053_v49  ;;  %v480_v52 = vpop.xlane.xlu0 %479 }
 0x149   : > { %v1067_v57 = vrot.slane %v482_v50, %v3541_v14  ;;  %v1062_v58 = vrot.slane %v480_v52, %v3547_v19 }
 0x14b   : > { %v1063_v63 = vsel %vm811_vm7, %v1062_v58, %v1058_v51  ;;  %621 = vadd.xlane.f32.xlu1 %v365_v55  ;;  %619 = vadd.xlane.f32.xlu0 %v364_v56  ;;  %v1444_v55 = vmul.f32 %v3418_v11, %v3418_v11  ;;  %v2911_v11 = vld [vmem:[%s3360_s3 + $0x60] sm:$0xff] }
 0x14c   : > { %v486_v0 = vpop.xlane.xlu1 %485  ;;  %v1068_v13 = vsel %vm818_vm8, %v1067_v57, %v1063_v63  ;;  %v484_v15 = vpop.xlane.xlu0 %483  ;;  %v2910_v63 = vld [vmem:[%s3360_s3 + $0x68] sm:$0xff] }
 0x14d   : > { %v1077_v16 = vrot.slane %v486_v0, %v3559_v36  ;;  %v1072_v17 = vrot.slane %v484_v15, %v3562_v37  ;;  %v1446_v0 = vmul.f32 %v2910_v63, %v2910_v63 }
 0x14f   : > { %v1073_v4 = vsel %vm825_vm9, %v1072_v17, %v1068_v13  ;;  %1563 = vadd.xlane.f32.xlu1 %v1434_v60  ;;  %1561 = vadd.xlane.f32.xlu0 %v1433_v59  ;;  %v1445_v13 = vmul.f32 %v2911_v11, %v2911_v11 }
 0x150   : > { %v490_v21 = vpop.xlane.xlu1 %489  ;;  %v1078_v24 = vsel %vm4489_vm10, %v1077_v16, %v1073_v4  ;;  %v488_v20 = vpop.xlane.xlu0 %487  ;;  %v2912_v4 = vld [vmem:[%s3360_s3 + $0x78] sm:$0xff] }
 0x151   : > { %v1087_v25 = vrot.slane %v490_v21, %v3569_v46  ;;  %v1082_v26 = vrot.slane %v488_v20, %v3572_v47  ;;  %v1448_v21 = vmul.f32 %v2912_v4, %v2912_v4 }
 0x153   : > { %v1083_v3 = vsel %vm839_vm11, %v1082_v26, %v1078_v24  ;;  %1567 = vadd.xlane.f32.xlu1 %v1436_v2  ;;  %1565 = vadd.xlane.f32.xlu0 %v1435_v22  ;;  %v2913_v24 = vld [vmem:[%s3360_s3 + $0x70] sm:$0xff] }
 0x154   : > { %v494_v28 = vpop.xlane.xlu1 %493  ;;  %v1088_v29 = vsel %vm846_vm12, %v1087_v25, %v1083_v3  ;;  %v492_v33 = vpop.xlane.xlu0 %491  ;;  %v1447_v20 = vmul.f32 %v2913_v24, %v2913_v24 }
 0x155   : > { %v1097_v23 = vrot.slane %v494_v28, %v3585_v18  ;;  %v1092_v35 = vrot.slane %v492_v33, %v3588_v62 }
 0x157   : > { %v1093_v6 = vsel %vm853_vm13, %v1092_v35, %v1088_v29  ;;  %1571 = vadd.xlane.f32.xlu1 %v1438_v27  ;;  %1569 = vadd.xlane.f32.xlu0 %v1437_v1  ;;  %v2914_v29 = vld [vmem:[%s3360_s3 + $0x88] sm:$0xff] }
 0x158   : > { %v1098_v40 = vsel %vm860_vm14, %v1097_v23, %v1093_v6  ;;  %v498_v41 = vpop.xlane.xlu1 %497  ;;  %v496_v42 = vpop.xlane.xlu0 %495  ;;  %v1450_v33 = vmul.f32 %v2914_v29, %v2914_v29  ;;  %v2915_v23 = vld [vmem:[%s3360_s3 + $0x80] sm:$0xff] }
 0x159   : > { %v3761_v43 = vsel %vm4486_vm15, %v1098_v40, %v3702_v61  ;;  %v1106_v44 = vrot.slane %v498_v41, %v3501_v32  ;;  %v1102_v48 = vrot.slane %v496_v42, %v3495_v30  ;;  %v1449_v35 = vmul.f32 %v2915_v23, %v2915_v23  ;;  %v2924_v23 = vld [vmem:[%s3360_s3 + $0xd8] sm:$0xff] }
 0x15a   : > { %vm4487_vm15 = vcmask 1044484  }
 0x15b   : > { %v1107_v49 = vsel %vm762_vm0, %v1106_v44, %v1102_v48  ;;  %1575 = vadd.xlane.f32.xlu1 %v1440_v38  ;;  %1573 = vadd.xlane.f32.xlu0 %v1439_v5  ;;  %v2916_v44 = vld [vmem:[%s3360_s3 + $0x98] sm:$0xff] }
 0x15c   : > { %v502_v50 = vpop.xlane.xlu1 %501  ;;  %v500_v51 = vpop.xlane.xlu0 %499  ;;  %v1452_v48 = vmul.f32 %v2916_v44, %v2916_v44 }
 0x15d   : > { %v1116_v61 = vrot.slane %v502_v50, %v3498_v31  ;;  %v1111_v52 = vrot.slane %v500_v51, %v3505_v34 }
 0x15f   : > { %v1112_v10 = vsel %vm769_vm1, %v1111_v52, %v1107_v49  ;;  %1579 = vadd.xlane.f32.xlu1 %v1442_v7  ;;  %1577 = vadd.xlane.f32.xlu0 %v1441_v8  ;;  %v2917_v7 = vld [vmem:[%s3360_s3 + $0x90] sm:$0xff] }
 0x160   : > { %v506_v56 = vpop.xlane.xlu1 %505  ;;  %v1117_v57 = vsel %vm776_vm2, %v1116_v61, %v1112_v10  ;;  %v504_v58 = vpop.xlane.xlu0 %503  ;;  %v1451_v8 = vmul.f32 %v2917_v7, %v2917_v7  ;;  %v2926_v7 = vld [vmem:[%s3360_s3 + $0xe8] sm:$0xff] }
 0x161   : > { %v1126_v59 = vrot.slane %v506_v56, %v3510_v39  ;;  %v1121_v60 = vrot.slane %v504_v58, %v3518_v45  ;;  %v2919_v56 = vld [vmem:[%s3360_s3 + $0xa0] sm:$0xff] }
 0x163   : > { %v1122_v12 = vsel %vm783_vm3, %v1121_v60, %v1117_v57  ;;  %1583 = vadd.xlane.f32.xlu1 %v1444_v55  ;;  %1581 = vadd.xlane.f32.xlu0 %v1443_v9  ;;  %v2918_v9 = vld [vmem:[%s3360_s3 + $0xa8] sm:$0xff]  ;;  %v1453_v57 = vmul.f32 %v2919_v56, %v2919_v56  ;;  %v2928_v56 = vld [vmem:[%s3360_s3 + $0xf8] sm:$0xff] }
 0x164   : > { %v510_v15 = vpop.xlane.xlu1 %509  ;;  %v1127_v16 = vsel %vm790_vm4, %v1126_v59, %v1122_v12  ;;  %v508_v17 = vpop.xlane.xlu0 %507  ;;  %v1454_v10 = vmul.f32 %v2918_v9, %v2918_v9 }
 0x165   : > { %v1136_v22 = vrot.slane %v510_v15, %v3526_v53  ;;  %v1131_v2 = vrot.slane %v508_v17, %v3529_v54  ;;  %v2921_v15 = vld [vmem:[%s3360_s3 + $0xb0] sm:$0xff] }
 0x167   : > { %v1132_v25 = vsel %vm797_vm5, %v1131_v2, %v1127_v16  ;;  %1587 = vadd.xlane.f32.xlu1 %v1446_v0  ;;  %1585 = vadd.xlane.f32.xlu0 %v1445_v13  ;;  %v2920_v13 = vld [vmem:[%s3360_s3 + $0xb8] sm:$0xff]  ;;  %v1455_v16 = vmul.f32 %v2921_v15, %v2921_v15  ;;  %v2930_v15 = vld [vmem:[%s3360_s3 + $0x108] sm:$0xff] }
 0x168   : > { %v514_v26 = vpop.xlane.xlu1 %513  ;;  %v1137_v27 = vsel %vm804_vm6, %v1136_v22, %v1132_v25  ;;  %v512_v1 = vpop.xlane.xlu0 %511  ;;  %v1456_v12 = vmul.f32 %v2920_v13, %v2920_v13  ;;  %v2922_v25 = vld [vmem:[%s3360_s3 + $0xc8] sm:$0xff] }
 0x169   : > { %v1146_v3 = vrot.slane %v514_v26, %v3541_v14  ;;  %v1141_v28 = vrot.slane %v512_v1, %v3547_v19  ;;  %v1458_v26 = vmul.f32 %v2922_v25, %v2922_v25 }
 0x16b   : > { %v1142_v38 = vsel %vm811_vm7, %v1141_v28, %v1137_v27  ;;  %1591 = vadd.xlane.f32.xlu1 %v1448_v21  ;;  %1589 = vadd.xlane.f32.xlu0 %v1447_v20  ;;  %v2923_v27 = vld [vmem:[%s3360_s3 + $0xc0] sm:$0xff] }
 0x16c   : > { %v518_v5 = vpop.xlane.xlu1 %517  ;;  %v1147_v6 = vsel %vm818_vm8, %v1146_v3, %v1142_v38  ;;  %v516_v40 = vpop.xlane.xlu0 %515  ;;  %v1457_v1 = vmul.f32 %v2923_v27, %v2923_v27  ;;  %v2925_v38 = vld [vmem:[%s3360_s3 + $0xd0] sm:$0xff]  ;;  %v2932_v27 = vld [vmem:[%s3360_s3 + $0x118] sm:$0xff] }
 0x16d   : > { %v1156_v41 = vrot.slane %v518_v5, %v3559_v36  ;;  %v1151_v42 = vrot.slane %v516_v40, %v3562_v37  ;;  %v1459_v5 = vmul.f32 %v2925_v38, %v2925_v38 }
 0x16f   : > { %v1152_v49 = vsel %vm825_vm9, %v1151_v42, %v1147_v6  ;;  %1595 = vadd.xlane.f32.xlu1 %v1450_v33  ;;  %1593 = vadd.xlane.f32.xlu0 %v1449_v35  ;;  %v1460_v35 = vmul.f32 %v2924_v23, %v2924_v23 }
 0x170   : > { %v522_v50 = vpop.xlane.xlu1 %521  ;;  %v1157_v51 = vsel %vm4489_vm10, %v1156_v41, %v1152_v49  ;;  %v520_v61 = vpop.xlane.xlu0 %519  ;;  %v2927_v49 = vld [vmem:[%s3360_s3 + $0xe0] sm:$0xff] }
 0x171   : > { %v1166_v52 = vrot.slane %v522_v50, %v3569_v46  ;;  %v1161_v55 = vrot.slane %v520_v61, %v3572_v47  ;;  %v1461_v50 = vmul.f32 %v2927_v49, %v2927_v49 }
 0x173   : > { %v1162_v58 = vsel %vm839_vm11, %v1161_v55, %v1157_v51  ;;  %1599 = vadd.xlane.f32.xlu1 %v1452_v48  ;;  %1597 = vadd.xlane.f32.xlu0 %v1451_v8  ;;  %v1462_v8 = vmul.f32 %v2926_v7, %v2926_v7 }
 0x174   : > { %v526_v59 = vpop.xlane.xlu1 %525  ;;  %v1167_v60 = vsel %vm846_vm12, %v1166_v52, %v1162_v58  ;;  %v524_v63 = vpop.xlane.xlu0 %523  ;;  %v2929_v58 = vld [vmem:[%s3360_s3 + $0xf0] sm:$0xff] }
 0x175   : > { %v1176_v0 = vrot.slane %v526_v59, %v3585_v18  ;;  %v1171_v11 = vrot.slane %v524_v63, %v3588_v62  ;;  %v1463_v59 = vmul.f32 %v2929_v58, %v2929_v58  ;;  %v2938_v58 = vld [vmem:[%s3360_s3 + $0x148] sm:$0xff] }
 0x177   : > { %v1172_v17 = vsel %vm853_vm13, %v1171_v11, %v1167_v60  ;;  %1603 = vadd.xlane.f32.xlu1 %v1454_v10  ;;  %1601 = vadd.xlane.f32.xlu0 %v1453_v57  ;;  %v1464_v57 = vmul.f32 %v2928_v56, %v2928_v56 }
 0x178   : > { %v1177_v22 = vsel %vm860_vm14, %v1176_v0, %v1172_v17  ;;  %v530_v2 = vpop.xlane.xlu1 %529  ;;  %v528_v4 = vpop.xlane.xlu0 %527  ;;  %v2931_v17 = vld [vmem:[%s3360_s3 + $0x100] sm:$0xff] }
 0x179   : > { %v3816_v21 = vsel %vm4487_vm15, %v1177_v22, %v3761_v43  ;;  %v1185_v24 = vrot.slane %v530_v2, %v3501_v32  ;;  %v1181_v20 = vrot.slane %v528_v4, %v3495_v30  ;;  %v1465_v22 = vmul.f32 %v2931_v17, %v2931_v17 }
 0x17a   : > { %vm4488_vm15 = vcmask 1045509  }
 0x17b   : > { %v1186_v3 = vsel %vm762_vm0, %v1185_v24, %v1181_v20  ;;  %1607 = vadd.xlane.f32.xlu1 %v1456_v12  ;;  %1605 = vadd.xlane.f32.xlu0 %v1455_v16  ;;  %v1466_v16 = vmul.f32 %v2930_v15, %v2930_v15  ;;  %v2941_v15 = vld [vmem:[%s3360_s3 + $0x150] sm:$0xff] }
 0x17c   : > { %v534_v28 = vpop.xlane.xlu1 %533  ;;  %v532_v29 = vpop.xlane.xlu0 %531 }
 0x17d   : > { %v1195_v33 = vrot.slane %v534_v28, %v3498_v31  ;;  %v1190_v43 = vrot.slane %v532_v29, %v3505_v34 }
 0x17f   : > { %v1191_v6 = vsel %vm769_vm1, %v1190_v43, %v1186_v3  ;;  %1611 = vadd.xlane.f32.xlu1 %v1458_v26  ;;  %1609 = vadd.xlane.f32.xlu0 %v1457_v1  ;;  %v1468_v1 = vmul.f32 %v2932_v27, %v2932_v27  ;;  %v2933_v3 = vld [vmem:[%s3360_s3 + $0x110] sm:$0xff] }
 0x180   : > { %v538_v40 = vpop.xlane.xlu1 %537  ;;  %v1196_v41 = vsel %vm776_vm2, %v1195_v33, %v1191_v6  ;;  %v536_v42 = vpop.xlane.xlu0 %535  ;;  %v1467_v28 = vmul.f32 %v2933_v3, %v2933_v3 }
 0x181   : > { %v1205_v44 = vrot.slane %v538_v40, %v3510_v39  ;;  %v1200_v48 = vrot.slane %v536_v42, %v3518_v45  ;;  %v2935_v40 = vld [vmem:[%s3360_s3 + $0x120] sm:$0xff] }
 0x183   : > { %v1201_v51 = vsel %vm783_vm3, %v1200_v48, %v1196_v41  ;;  %1615 = vadd.xlane.f32.xlu1 %v1460_v35  ;;  %1613 = vadd.xlane.f32.xlu0 %v1459_v5  ;;  %v2934_v5 = vld [vmem:[%s3360_s3 + $0x128] sm:$0xff]  ;;  %v1469_v41 = vmul.f32 %v2935_v40, %v2935_v40 }
 0x184   : > { %v542_v61 = vpop.xlane.xlu1 %541  ;;  %v1206_v52 = vsel %vm790_vm4, %v1205_v44, %v1201_v51  ;;  %v540_v55 = vpop.xlane.xlu0 %539  ;;  %v1470_v6 = vmul.f32 %v2934_v5, %v2934_v5 }
 0x185   : > { %v1215_v9 = vrot.slane %v542_v61, %v3526_v53  ;;  %v1210_v10 = vrot.slane %v540_v55, %v3529_v54  ;;  %v2937_v61 = vld [vmem:[%s3360_s3 + $0x130] sm:$0xff] }
 0x187   : > { %v1211_v60 = vsel %vm797_vm5, %v1210_v10, %v1206_v52  ;;  %1619 = vadd.xlane.f32.xlu1 %v1462_v8  ;;  %1617 = vadd.xlane.f32.xlu0 %v1461_v50  ;;  %v2936_v50 = vld [vmem:[%s3360_s3 + $0x138] sm:$0xff]  ;;  %v1471_v52 = vmul.f32 %v2937_v61, %v2937_v61 }
 0x188   : > { %v546_v63 = vpop.xlane.xlu1 %545  ;;  %v1216_v0 = vsel %vm804_vm6, %v1215_v9, %v1211_v60  ;;  %v544_v11 = vpop.xlane.xlu0 %543  ;;  %v1472_v51 = vmul.f32 %v2936_v50, %v2936_v50  ;;  %v2939_v60 = vld [vmem:[%s3360_s3 + $0x140] sm:$0xff] }
 0x189   : > { %v1225_v13 = vrot.slane %v546_v63, %v3541_v14  ;;  %v1220_v12 = vrot.slane %v544_v11, %v3547_v19  ;;  %v1473_v63 = vmul.f32 %v2939_v60, %v2939_v60  ;;  %v2953_v60 = vld [vmem:[%s3360_s3 + $0x1b0] sm:$0xff] }
 0x18b   : > { %v1221_v2 = vsel %vm811_vm7, %v1220_v12, %v1216_v0  ;;  %1623 = vadd.xlane.f32.xlu1 %v1464_v57  ;;  %1621 = vadd.xlane.f32.xlu0 %v1463_v59  ;;  %v1474_v59 = vmul.f32 %v2938_v58, %v2938_v58  ;;  %v2952_v58 = vld [vmem:[%s3360_s3 + $0x1b8] sm:$0xff] }
 0x18c   : > { %v550_v4 = vpop.xlane.xlu1 %549  ;;  %v1226_v24 = vsel %vm818_vm8, %v1225_v13, %v1221_v2  ;;  %v548_v20 = vpop.xlane.xlu0 %547  ;;  %v2940_v13 = vld [vmem:[%s3360_s3 + $0x158] sm:$0xff] }
 0x18d   : > { %v1235_v25 = vrot.slane %v550_v4, %v3559_v36  ;;  %v1230_v26 = vrot.slane %v548_v20, %v3562_v37  ;;  %v1476_v12 = vmul.f32 %v2940_v13, %v2940_v13  ;;  %v2943_v4 = vld [vmem:[%s3360_s3 + $0x160] sm:$0xff] }
 0x18f   : > { %v1231_v29 = vsel %vm825_vm9, %v1230_v26, %v1226_v24  ;;  %1627 = vadd.xlane.f32.xlu1 %v1466_v16  ;;  %1625 = vadd.xlane.f32.xlu0 %v1465_v22  ;;  %v1475_v16 = vmul.f32 %v2941_v15, %v2941_v15  ;;  %v2942_v22 = vld [vmem:[%s3360_s3 + $0x168] sm:$0xff]  ;;  %v1477_v24 = vmul.f32 %v2943_v4, %v2943_v4  ;;  %v2944_v26 = vld [vmem:[%s3360_s3 + $0x178] sm:$0xff] }
 0x190   : > { %v554_v33 = vpop.xlane.xlu1 %553  ;;  %v1236_v43 = vsel %vm4489_vm10, %v1235_v25, %v1231_v29  ;;  %v552_v23 = vpop.xlane.xlu0 %551  ;;  %v1478_v2 = vmul.f32 %v2942_v22, %v2942_v22  ;;  %v1480_v27 = vmul.f32 %v2944_v26, %v2944_v26 }
 0x191   : > { %v1245_v35 = vrot.slane %v554_v33, %v3569_v46  ;;  %v1240_v38 = vrot.slane %v552_v23, %v3572_v47  ;;  %v2946_v33 = vld [vmem:[%s3360_s3 + $0x188] sm:$0xff]  ;;  %v2947_v23 = vld [vmem:[%s3360_s3 + $0x180] sm:$0xff] }
 0x193   : > { %v1241_v42 = vsel %vm839_vm11, %v1240_v38, %v1236_v43  ;;  %1631 = vadd.xlane.f32.xlu1 %v1468_v1  ;;  %1629 = vadd.xlane.f32.xlu0 %v1467_v28  ;;  %v2945_v1 = vld [vmem:[%s3360_s3 + $0x170] sm:$0xff]  ;;  %v1482_v43 = vmul.f32 %v2946_v33, %v2946_v33 }
 0x194   : > { %v558_v44 = vpop.xlane.xlu1 %557  ;;  %v1246_v48 = vsel %vm846_vm12, %v1245_v35, %v1241_v42  ;;  %v556_v7 = vpop.xlane.xlu0 %555  ;;  %v1479_v3 = vmul.f32 %v2945_v1, %v2945_v1  ;;  %v1481_v35 = vmul.f32 %v2947_v23, %v2947_v23 }
 0x195   : > { %v1255_v8 = vrot.slane %v558_v44, %v3585_v18  ;;  %v1250_v49 = vrot.slane %v556_v7, %v3588_v62  ;;  %v2950_v7 = vld [vmem:[%s3360_s3 + $0x1a8] sm:$0xff] }
 0x197   : > { %v1251_v55 = vsel %vm853_vm13, %v1250_v49, %v1246_v48  ;;  %1635 = vadd.xlane.f32.xlu1 %v1470_v6  ;;  %1633 = vadd.xlane.f32.xlu0 %v1469_v41  ;;  %v2948_v6 = vld [vmem:[%s3360_s3 + $0x198] sm:$0xff]  ;;  %v2949_v41 = vld [vmem:[%s3360_s3 + $0x190] sm:$0xff]  ;;  %v2951_v49 = vld [vmem:[%s3360_s3 + $0x1a0] sm:$0xff] }
 0x198   : > { %v1256_v9 = vsel %vm860_vm14, %v1255_v8, %v1251_v55  ;;  %v3865_v10 = vpop.xlane.xlu1 %561  ;;  %v3867_v56 = vpop.xlane.xlu0 %559  ;;  %v1484_v40 = vmul.f32 %v2948_v6, %v2948_v6  ;;  %v1483_v42 = vmul.f32 %v2949_v41, %v2949_v41  ;;  %v1486_v8 = vmul.f32 %v2950_v7, %v2950_v7  ;;  %v2956_v6 = vld [vmem:[%s3360_s3 + $0x1d8] sm:$0xff]  ;;  %v2957_v41 = vld [vmem:[%s3360_s3 + $0x1d0] sm:$0xff] }
 0x199   : > { %v3871_v57 = vsel %vm4488_vm15, %v1256_v9, %v3816_v21  ;;  %v1485_v50 = vmul.f32 %v2951_v49, %v2951_v49  ;;  %v1260_v55 = vrot.slane %v3867_v56, %v3495_v30  ;;  %vm1425_vm15 = vcmask 1046534  }
 0x19b   : > { %1639 = vadd.xlane.f32.xlu1 %v1472_v51  ;;  %1637 = vadd.xlane.f32.xlu0 %v1471_v52  ;;  %v1264_v52 = vrot.slane %v3865_v10, %v3501_v32 }
 0x19c   : > { %v3875_v0 = vpop.xlane.xlu1 %565  ;;  %v3877_v11 = vpop.xlane.xlu0 %563 }
 0x19d   : > { %v1269_v9 = vrot.slane %v3877_v11, %v3505_v34  ;;  %v1265_v15 = vsel %vm762_vm0, %v1264_v52, %v1260_v55  ;;  %v1274_v10 = vrot.slane %v3875_v0, %v3498_v31 }
 0x19f   : > { %1643 = vadd.xlane.f32.xlu1 %v1474_v59  ;;  %1641 = vadd.xlane.f32.xlu0 %v1473_v63  ;;  %v1488_v59 = vmul.f32 %v2952_v58, %v2952_v58  ;;  %v1487_v63 = vmul.f32 %v2953_v60, %v2953_v60  ;;  %v1270_v56 = vsel %vm769_vm1, %v1269_v9, %v1265_v15 }
 0x1a0   : > { %v3881_v21 = vpop.xlane.xlu1 %569  ;;  %v3883_v17 = vpop.xlane.xlu0 %567 }
 0x1a1   : > { %v1284_v0 = vrot.slane %v3881_v21, %v3510_v39 }
 0x1a3   : > { %1647 = vadd.xlane.f32.xlu1 %v1476_v12  ;;  %1645 = vadd.xlane.f32.xlu0 %v1475_v16  ;;  %v1279_v16 = vrot.slane %v3883_v17, %v3518_v45 }
 0x1a4   : > { %v3887_v20 = vpop.xlane.xlu1 %573  ;;  %v3889_v25 = vpop.xlane.xlu0 %571 }
 0x1a5   : > { %v1294_v49 = vrot.slane %v3887_v20, %v3526_v53 }
 0x1a7   : > { %1651 = vadd.xlane.f32.xlu1 %v1478_v2  ;;  %1649 = vadd.xlane.f32.xlu0 %v1477_v24  ;;  %v2954_v2 = vld [vmem:[%s3360_s3 + $0x1c8] sm:$0xff]  ;;  %v2955_v24 = vld [vmem:[%s3360_s3 + $0x1c0] sm:$0xff] }
 0x1a8   : > { %v3893_v28 = vpop.xlane.xlu1 %577  ;;  %v3895_v29 = vpop.xlane.xlu0 %575  ;;  %v1490_v4 = vmul.f32 %v2954_v2, %v2954_v2  ;;  %v1489_v26 = vmul.f32 %v2955_v24, %v2955_v24 }
 0x1a9   : > { %v1299_v55 = vrot.slane %v3895_v29, %v3547_v19 }
 0x1ab   : > { %1655 = vadd.xlane.f32.xlu1 %v1480_v27  ;;  %1653 = vadd.xlane.f32.xlu0 %v1479_v3  ;;  %v1275_v3 = vsel %vm776_vm2, %v1274_v10, %v1270_v56  ;;  %v1304_v10 = vrot.slane %v3893_v28, %v3541_v14 }
 0x1ac   : > { %v3899_v38 = vpop.xlane.xlu1 %581  ;;  %v3901_v5 = vpop.xlane.xlu0 %579  ;;  %v1280_v33 = vsel %vm783_vm3, %v1279_v16, %v1275_v3 }
 0x1ad   : > { %v1314_v3 = vrot.slane %v3899_v38, %v3559_v36 }
 0x1af   : > { %1659 = vadd.xlane.f32.xlu1 %v1482_v43  ;;  %1657 = vadd.xlane.f32.xlu0 %v1481_v35  ;;  %v1289_v43 = vrot.slane %v3889_v25, %v3529_v54  ;;  %v1285_v25 = vsel %vm790_vm4, %v1284_v0, %v1280_v33 }
 0x1b0   : > { %v3905_v44 = vpop.xlane.xlu1 %585  ;;  %v3907_v48 = vpop.xlane.xlu0 %583 }
 0x1b1   : > { %v1290_v52 = vsel %vm797_vm5, %v1289_v43, %v1285_v25  ;;  %v1319_v43 = vrot.slane %v3907_v48, %v3572_v47 }
 0x1b2   : > { %v1295_v29 = vsel %vm804_vm6, %v1294_v49, %v1290_v52 }
 0x1b3   : > { %1663 = vadd.xlane.f32.xlu1 %v1484_v40  ;;  %1661 = vadd.xlane.f32.xlu0 %v1483_v42  ;;  %v1492_v40 = vmul.f32 %v2956_v6, %v2956_v6  ;;  %v1491_v42 = vmul.f32 %v2957_v41, %v2957_v41  ;;  %v1300_v16 = vsel %vm811_vm7, %v1299_v55, %v1295_v29  ;;  %v2962_v6 = vld [vmem:[%s3360_s3 + $0x208] sm:$0xff]  ;;  %v2963_v41 = vld [vmem:[%s3360_s3 + $0x200] sm:$0xff] }
 0x1b4   : > { %v3911_v51 = vpop.xlane.xlu1 %589  ;;  %v3913_v61 = vpop.xlane.xlu0 %587 }
 0x1b7   : > { %1667 = vadd.xlane.f32.xlu1 %v1486_v8  ;;  %1665 = vadd.xlane.f32.xlu0 %v1485_v50 }
 0x1b8   : > { %v594_v13 = vpop.xlane.xlu1 %593  ;;  %v592_v12 = vpop.xlane.xlu0 %591 }
 0x1b9   : > { %v1343_v11 = vrot.slane %v594_v13, %v3501_v32  ;;  %v1339_v22 = vrot.slane %v592_v12, %v3495_v30 }
 0x1bb   : > { %1671 = vadd.xlane.f32.xlu1 %v1488_v59  ;;  %1669 = vadd.xlane.f32.xlu0 %v1487_v63  ;;  %v1344_v23 = vsel %vm762_vm0, %v1343_v11, %v1339_v22  ;;  %v2958_v59 = vld [vmem:[%s3360_s3 + $0x1e8] sm:$0xff]  ;;  %v2959_v63 = vld [vmem:[%s3360_s3 + $0x1e0] sm:$0xff]  ;;  %v1309_v11 = vrot.slane %v3901_v5, %v3562_v37  ;;  %v1305_v5 = vsel %vm818_vm8, %v1304_v10, %v1300_v16 }
 0x1bc   : > { %v598_v27 = vpop.xlane.xlu1 %597  ;;  %v596_v1 = vpop.xlane.xlu0 %595  ;;  %v1494_v60 = vmul.f32 %v2958_v59, %v2958_v59  ;;  %v1493_v13 = vmul.f32 %v2959_v63, %v2959_v63  ;;  %v2965_v59 = vld [vmem:[%s3360_s3 + $0x210] sm:$0xff] }
 0x1bd   : > { %v1348_v17 = vrot.slane %v596_v1, %v3505_v34  ;;  %v1353_v35 = vrot.slane %v598_v27, %v3498_v31  ;;  %v1310_v33 = vsel %vm825_vm9, %v1309_v11, %v1305_v5  ;;  %v2967_v11 = vld [vmem:[%s3360_s3 + $0x220] sm:$0xff] }
 0x1be   : > { %v1315_v48 = vsel %vm4489_vm10, %v1314_v3, %v1310_v33  ;;  %v2969_v3 = vld [vmem:[%s3360_s3 + $0x230] sm:$0xff]  ;;  %v366_v33 = vld [vmem:[%s3370_s22] sm:$0xff] }
 0x1bf   : > { %v1349_v21 = vsel %vm769_vm1, %v1348_v17, %v1344_v23  ;;  %1675 = vadd.xlane.f32.xlu1 %v1490_v4  ;;  %1673 = vadd.xlane.f32.xlu0 %v1489_v26  ;;  %v2960_v4 = vld [vmem:[%s3360_s3 + $0x1f8] sm:$0xff]  ;;  %v2961_v26 = vld [vmem:[%s3360_s3 + $0x1f0] sm:$0xff]  ;;  %v1320_v25 = vsel %vm839_vm11, %v1319_v43, %v1315_v48  ;;  %v1503_v5 = vmul.f32 %v2969_v3, %v2969_v3 }
 0x1c0   : > { %v602_v7 = vpop.xlane.xlu1 %601  ;;  %v600_v8 = vpop.xlane.xlu0 %599  ;;  %v1354_v58 = vsel %vm776_vm2, %v1353_v35, %v1349_v21  ;;  %v1496_v24 = vmul.f32 %v2960_v4, %v2960_v4  ;;  %v1495_v27 = vmul.f32 %v2961_v26, %v2961_v26 }
 0x1c1   : > { %v1358_v50 = vrot.slane %v600_v8, %v3518_v45  ;;  %v1363_v9 = vrot.slane %v602_v7, %v3510_v39  ;;  %v1324_v8 = vrot.slane %v3905_v44, %v3569_v46 }
 0x1c3   : > { %v1359_v20 = vsel %vm783_vm3, %v1358_v50, %v1354_v58  ;;  %1679 = vadd.xlane.f32.xlu1 %v1492_v40  ;;  %1677 = vadd.xlane.f32.xlu0 %v1491_v42  ;;  %v1498_v40 = vmul.f32 %v2962_v6, %v2962_v6  ;;  %v1497_v42 = vmul.f32 %v2963_v41, %v2963_v41 }
 0x1c4   : > { %v606_v12 = vpop.xlane.xlu1 %605  ;;  %v604_v15 = vpop.xlane.xlu0 %603  ;;  %v1364_v2 = vsel %vm790_vm4, %v1363_v9, %v1359_v20  ;;  %v1329_v50 = vrot.slane %v3913_v61, %v3588_v62  ;;  %v2964_v9 = vld [vmem:[%s3360_s3 + $0x218] sm:$0xff]  ;;  %v1334_v20 = vrot.slane %v3911_v51, %v3585_v18  ;;  %v1325_v61 = vsel %vm846_vm12, %v1324_v8, %v1320_v25  ;;  %v2971_v8 = vld [vmem:[%s3360_s3 + $0x240] sm:$0xff] }
 0x1c5   : > { %v1368_v56 = vrot.slane %v604_v15, %v3529_v54  ;;  %v1373_v22 = vrot.slane %v606_v12, %v3526_v53  ;;  %v1500_v58 = vmul.f32 %v2964_v9, %v2964_v9  ;;  %v1505_v48 = vmul.f32 %v2971_v8, %v2971_v8 }
 0x1c6   : > { %v1330_v15 = vsel %vm853_vm13, %v1329_v50, %v1325_v61 }
 0x1c7   : > { %v1369_v28 = vsel %vm797_vm5, %v1368_v56, %v1364_v2  ;;  %1683 = vadd.xlane.f32.xlu1 %v1494_v60  ;;  %1681 = vadd.xlane.f32.xlu0 %v1493_v13  ;;  %v1499_v60 = vmul.f32 %v2965_v59, %v2965_v59  ;;  %v2966_v56 = vld [vmem:[%s3360_s3 + $0x228] sm:$0xff] }
 0x1c8   : > { %v610_v1 = vpop.xlane.xlu1 %609  ;;  %v608_v0 = vpop.xlane.xlu0 %607  ;;  %v1374_v35 = vsel %vm804_vm6, %v1373_v22, %v1369_v28  ;;  %v1502_v16 = vmul.f32 %v2966_v56, %v2966_v56  ;;  %v1501_v22 = vmul.f32 %v2967_v11, %v2967_v11 }
 0x1c9   : > { %v1378_v17 = vrot.slane %v608_v0, %v3547_v19  ;;  %v1383_v23 = vrot.slane %v610_v1, %v3541_v14  ;;  %v2968_v1 = vld [vmem:[%s3360_s3 + $0x238] sm:$0xff] }
 0x1ca   : > { %v1504_v0 = vmul.f32 %v2968_v1, %v2968_v1 }
 0x1cb   : > { %v1379_v38 = vsel %vm811_vm7, %v1378_v17, %v1374_v35  ;;  %1687 = vadd.xlane.f32.xlu1 %v1496_v24  ;;  %1685 = vadd.xlane.f32.xlu0 %v1495_v27  ;;  %v1335_v24 = vsel %vm860_vm14, %v1334_v20, %v1330_v15 }
 0x1cc   : > { %v614_v21 = vpop.xlane.xlu1 %613  ;;  %v612_v7 = vpop.xlane.xlu0 %611  ;;  %v1384_v55 = vsel %vm818_vm8, %v1383_v23, %v1379_v38  ;;  %v1426_v6 = vsel %vm1425_vm15, %v1335_v24, %v3871_v57 }
 0x1cd   : > { %v1388_v49 = vrot.slane %v612_v7, %v3562_v37  ;;  %v1393_v52 = vrot.slane %v614_v21, %v3559_v36  ;;  %v2970_v21 = vld [vmem:[%s3360_s3 + $0x248] sm:$0xff] }
 0x1ce   : > { %v1506_v7 = vmul.f32 %v2970_v21, %v2970_v21 }
 0x1cf   : > { %v1389_v44 = vsel %vm825_vm9, %v1388_v49, %v1384_v55  ;;  %1691 = vadd.xlane.f32.xlu1 %v1498_v40  ;;  %1689 = vadd.xlane.f32.xlu0 %v1497_v42  ;;  %v2972_v55 = vld [vmem:[%s3360_s3 + $0x258] sm:$0xff] }
 0x1d0   : > { %v618_v63 = vpop.xlane.xlu1 %617  ;;  %v616_v13 = vpop.xlane.xlu0 %615  ;;  %v1394_v29 = vsel %vm4489_vm10, %v1393_v52, %v1389_v44  ;;  %vm4490_vm10 = vcmask 1047559   ;;  %v1508_v9 = vmul.f32 %v2972_v55, %v2972_v55 }
 0x1d1   : > { %v1398_v12 = vrot.slane %v616_v13, %v3572_v47  ;;  %v1403_v10 = vrot.slane %v618_v63, %v3569_v46 }
 0x1d3   : > { %v1399_v2 = vsel %vm839_vm11, %v1398_v12, %v1394_v29  ;;  %1695 = vadd.xlane.f32.xlu1 %v1500_v58  ;;  %1693 = vadd.xlane.f32.xlu0 %v1499_v60  ;;  %v2973_v58 = vld [vmem:[%s3360_s3 + $0x250] sm:$0xff]  ;;  %v2974_v12 = vld [vmem:[%s3360_s3 + $0x268] sm:$0xff] }
 0x1d4   : > { %v622_v51 = vpop.xlane.xlu1 %621  ;;  %v620_v4 = vpop.xlane.xlu0 %619  ;;  %v1404_v28 = vsel %vm846_vm12, %v1403_v10, %v1399_v2  ;;  %v1507_v59 = vmul.f32 %v2973_v58, %v2973_v58  ;;  %v1510_v15 = vmul.f32 %v2974_v12, %v2974_v12  ;;  %v2975_v10 = vld [vmem:[%s3360_s3 + $0x260] sm:$0xff]  ;;  %v2982_v58 = vld [vmem:[%s3360_s3 + $0x298] sm:$0xff] }
 0x1d5   : > { %v1413_v26 = vrot.slane %v622_v51, %v3585_v18  ;;  %v1408_v27 = vrot.slane %v620_v4, %v3588_v62  ;;  %v1509_v29 = vmul.f32 %v2975_v10, %v2975_v10  ;;  %v2976_v4 = vld [vmem:[%s3360_s3 + $0x278] sm:$0xff]  ;;  %v2984_v10 = vld [vmem:[%s3360_s3 + $0x310] sm:$0xff] }
 0x1d6   : > { %v1512_v24 = vmul.f32 %v2976_v4, %v2976_v4 }
 0x1d7   : > { %v1409_v17 = vsel %vm853_vm13, %v1408_v27, %v1404_v28  ;;  %1699 = vadd.xlane.f32.xlu1 %v1502_v16  ;;  %1697 = vadd.xlane.f32.xlu0 %v1501_v22 }
 0x1d8   : > { %v1414_v43 = vsel %vm860_vm14, %v1413_v26, %v1409_v17  ;;  %v1564_v23 = vpop.xlane.xlu1 %1563  ;;  %v1562_v35 = vpop.xlane.xlu0 %1561  ;;  %v2977_v26 = vld [vmem:[%s3360_s3 + $0x270] sm:$0xff] }
 0x1d9   : > { %v1952_v40 = vrot.slane %v1564_v23, %v3501_v32  ;;  %v1948_v41 = vrot.slane %v1562_v35, %v3495_v30  ;;  %v1428_v42 = vsel %vm4490_vm10, %v1414_v43, %v1426_v6  ;;  %v1511_v27 = vmul.f32 %v2977_v26, %v2977_v26  ;;  %v2979_v23 = vld [vmem:[%s3360_s3 + $0x280] sm:$0xff] }
 0x1da   : > { %v1430_v38 = vadd.f32 %v1428_v42, %v366_v33  ;;  %v2978_v33 = vld [vmem:[%s3360_s3 + $0x288] sm:$0xff]  ;;  %v1513_v35 = vmul.f32 %v2979_v23, %v2979_v23  ;;  %vm4503_vm10 = vcmask 786112   ;;  %v2986_v26 = vld [vmem:[%s3360_s3 + $0x2a0] sm:$0xff] }
 0x1db   : > { %v1953_v49 = vsel %vm762_vm0, %v1952_v40, %v1948_v41  ;;  %1703 = vadd.xlane.f32.xlu1 %v1504_v0  ;;  %1701 = vadd.xlane.f32.xlu0 %v1503_v5  ;;  %v1514_v43 = vmul.f32 %v2978_v33, %v2978_v33 }
 0x1dc   : > { %v1568_v25 = vpop.xlane.xlu1 %1567  ;;  %v1566_v50 = vpop.xlane.xlu0 %1565  ;;  %1431 = vst [vmem:[%s3370_s22] sm:$0xff] %v1430_v38 }
 0x1dd   : > { %v1962_v57 = vrot.slane %v1568_v25, %v3498_v31  ;;  %v1957_v52 = vrot.slane %v1566_v50, %v3505_v34 }
 0x1df   : > { %v1958_v60 = vsel %vm769_vm1, %v1957_v52, %v1953_v49  ;;  %1707 = vadd.xlane.f32.xlu1 %v1506_v7  ;;  %1705 = vadd.xlane.f32.xlu0 %v1505_v48  ;;  %v2980_v7 = vld [vmem:[%s3360_s3 + $0x290] sm:$0xff]  ;;  %v2981_v48 = vld [vmem:[%s3360_s3 + $0x300] sm:$0xff] }
 0x1e0   : > { %v1572_v44 = vpop.xlane.xlu1 %1571  ;;  %v1963_v63 = vsel %vm776_vm2, %v1962_v57, %v1958_v60  ;;  %v1570_v13 = vpop.xlane.xlu0 %1569  ;;  %v1515_v8 = vmul.f32 %v2980_v7, %v2980_v7  ;;  %v1529_v49 = vmul.f32 %v2981_v48, %v2981_v48  ;;  %v2983_v60 = vld [vmem:[%s3360_s3 + $0x308] sm:$0xff] }
 0x1e1   : > { %v1972_v20 = vrot.slane %v1572_v44, %v3510_v39  ;;  %v1967_v61 = vrot.slane %v1570_v13, %v3518_v45  ;;  %v1530_v44 = vmul.f32 %v2983_v60, %v2983_v60 }
 0x1e3   : > { %v1968_v56 = vsel %vm783_vm3, %v1967_v61, %v1963_v63  ;;  %1711 = vadd.xlane.f32.xlu1 %v1508_v9  ;;  %1709 = vadd.xlane.f32.xlu0 %v1507_v59  ;;  %v1516_v59 = vmul.f32 %v2982_v58, %v2982_v58 }
 0x1e4   : > { %v1576_v16 = vpop.xlane.xlu1 %1575  ;;  %v1973_v11 = vsel %vm790_vm4, %v1972_v20, %v1968_v56  ;;  %v1574_v22 = vpop.xlane.xlu0 %1573  ;;  %v2985_v56 = vld [vmem:[%s3360_s3 + $0x380] sm:$0xff] }
 0x1e5   : > { %v1982_v2 = vrot.slane %v1576_v16, %v3526_v53  ;;  %v1977_v51 = vrot.slane %v1574_v22, %v3529_v54  ;;  %v1545_v16 = vmul.f32 %v2985_v56, %v2985_v56 }
 0x1e7   : > { %v1978_v28 = vsel %vm797_vm5, %v1977_v51, %v1973_v11  ;;  %1715 = vadd.xlane.f32.xlu1 %v1510_v15  ;;  %1713 = vadd.xlane.f32.xlu0 %v1509_v29  ;;  %v1531_v29 = vmul.f32 %v2984_v10, %v2984_v10 }
 0x1e8   : > { %v1580_v1 = vpop.xlane.xlu1 %1579  ;;  %v1983_v0 = vsel %vm804_vm6, %v1982_v2, %v1978_v28  ;;  %v1578_v3 = vpop.xlane.xlu0 %1577  ;;  %v2987_v28 = vld [vmem:[%s3360_s3 + $0x388] sm:$0xff] }
 0x1e9   : > { %v1992_v5 = vrot.slane %v1580_v1, %v3541_v14  ;;  %v1987_v17 = vrot.slane %v1578_v3, %v3547_v19  ;;  %v1546_v1 = vmul.f32 %v2987_v28, %v2987_v28  ;;  %v2996_v28 = vld [vmem:[%s3360_s3 + $0x2b8] sm:$0xff] }
 0x1eb   : > { %v1988_v6 = vsel %vm811_vm7, %v1987_v17, %v1983_v0  ;;  %1719 = vadd.xlane.f32.xlu1 %v1512_v24  ;;  %1717 = vadd.xlane.f32.xlu0 %v1511_v27  ;;  %v1517_v27 = vmul.f32 %v2986_v26, %v2986_v26 }
 0x1ec   : > { %v1584_v40 = vpop.xlane.xlu1 %1583  ;;  %v1993_v41 = vsel %vm818_vm8, %v1992_v5, %v1988_v6  ;;  %v1582_v42 = vpop.xlane.xlu0 %1581 }
 0x1ed   : > { %v2002_v38 = vrot.slane %v1584_v40, %v3559_v36  ;;  %v1997_v21 = vrot.slane %v1582_v42, %v3562_v37 }
 0x1ef   : > { %v1998_v25 = vsel %vm825_vm9, %v1997_v21, %v1993_v41  ;;  %1723 = vadd.xlane.f32.xlu1 %v1514_v43  ;;  %1721 = vadd.xlane.f32.xlu0 %v1513_v35  ;;  %v2988_v43 = vld [vmem:[%s3360_s3 + $0x318] sm:$0xff]  ;;  %v2989_v35 = vld [vmem:[%s3360_s3 + $0x390] sm:$0xff] }
 0x1f0   : > { %v1588_v50 = vpop.xlane.xlu1 %1587  ;;  %v2003_v57 = vsel %vm4503_vm10, %v2002_v38, %v1998_v25  ;;  %v1586_v52 = vpop.xlane.xlu0 %1585  ;;  %v1532_v23 = vmul.f32 %v2988_v43, %v2988_v43  ;;  %v1547_v6 = vmul.f32 %v2989_v35, %v2989_v35 }
 0x1f1   : > { %v2012_v55 = vrot.slane %v1588_v50, %v3569_v46  ;;  %v2007_v9 = vrot.slane %v1586_v52, %v3572_v47 }
 0x1f3   : > { %v2008_v63 = vsel %vm839_vm11, %v2007_v9, %v2003_v57  ;;  %1753 = vadd.xlane.f32.xlu1 %v1529_v49  ;;  %1725 = vadd.xlane.f32.xlu0 %v1515_v8  ;;  %v2990_v8 = vld [vmem:[%s3360_s3 + $0x2a8] sm:$0xff]  ;;  %v2991_v49 = vld [vmem:[%s3360_s3 + $0x320] sm:$0xff] }
 0x1f4   : > { %v1592_v13 = vpop.xlane.xlu1 %1591  ;;  %v2013_v20 = vsel %vm846_vm12, %v2012_v55, %v2008_v63  ;;  %v1590_v61 = vpop.xlane.xlu0 %1589  ;;  %v1518_v48 = vmul.f32 %v2990_v8, %v2990_v8  ;;  %v1533_v25 = vmul.f32 %v2991_v49, %v2991_v49 }
 0x1f5   : > { %v2022_v12 = vrot.slane %v1592_v13, %v3585_v18  ;;  %v2017_v15 = vrot.slane %v1590_v61, %v3588_v62 }
 0x1f7   : > { %v2018_v11 = vsel %vm853_vm13, %v2017_v15, %v2013_v20  ;;  %1727 = vadd.xlane.f32.xlu1 %v1516_v59  ;;  %1755 = vadd.xlane.f32.xlu0 %v1530_v44  ;;  %v2992_v59 = vld [vmem:[%s3360_s3 + $0x2b0] sm:$0xff]  ;;  %v2993_v44 = vld [vmem:[%s3360_s3 + $0x398] sm:$0xff] }
 0x1f8   : > { %v4063_v22 = vsel %vm860_vm14, %v2022_v12, %v2018_v11  ;;  %v1596_v2 = vpop.xlane.xlu1 %1595  ;;  %v1594_v51 = vpop.xlane.xlu0 %1593  ;;  %v1519_v60 = vmul.f32 %v2992_v59, %v2992_v59  ;;  %v1548_v63 = vmul.f32 %v2993_v44, %v2993_v44 }
 0x1f9   : > { %v2031_v4 = vrot.slane %v1596_v2, %v3501_v32  ;;  %v2027_v24 = vrot.slane %v1594_v51, %v3495_v30 }
 0x1fb   : > { %v2032_v0 = vsel %vm762_vm0, %v2031_v4, %v2027_v24  ;;  %1785 = vadd.xlane.f32.xlu1 %v1545_v16  ;;  %1757 = vadd.xlane.f32.xlu0 %v1531_v29  ;;  %v2994_v29 = vld [vmem:[%s3360_s3 + $0x328] sm:$0xff]  ;;  %v2995_v16 = vld [vmem:[%s3360_s3 + $0x3a0] sm:$0xff] }
 0x1fc   : > { %v1600_v3 = vpop.xlane.xlu1 %1599  ;;  %v1598_v5 = vpop.xlane.xlu0 %1597  ;;  %v1534_v56 = vmul.f32 %v2994_v29, %v2994_v29  ;;  %v1549_v11 = vmul.f32 %v2995_v16, %v2995_v16  ;;  %v3004_v16 = vld [vmem:[%s3360_s3 + $0x2d0] sm:$0xff] }
 0x1fd   : > { %v2041_v17 = vrot.slane %v1600_v3, %v3498_v31  ;;  %v2036_v33 = vrot.slane %v1598_v5, %v3505_v34 }
 0x1ff   : > { %v2037_v40 = vsel %vm769_vm1, %v2036_v33, %v2032_v0  ;;  %1729 = vadd.xlane.f32.xlu1 %v1517_v27  ;;  %1787 = vadd.xlane.f32.xlu0 %v1546_v1  ;;  %v1520_v1 = vmul.f32 %v2996_v28, %v2996_v28  ;;  %v2997_v0 = vld [vmem:[%s3360_s3 + $0x330] sm:$0xff] }
 0x200   : > { %v1604_v41 = vpop.xlane.xlu1 %1603  ;;  %v2042_v42 = vsel %vm776_vm2, %v2041_v17, %v2037_v40  ;;  %v1602_v38 = vpop.xlane.xlu0 %1601  ;;  %v1535_v3 = vmul.f32 %v2997_v0, %v2997_v0  ;;  %v3006_v0 = vld [vmem:[%s3360_s3 + $0x348] sm:$0xff] }
 0x201   : > { %v2051_v21 = vrot.slane %v1604_v41, %v3510_v39  ;;  %v2046_v7 = vrot.slane %v1602_v38, %v3518_v45  ;;  %v2999_v41 = vld [vmem:[%s3360_s3 + $0x3a8] sm:$0xff] }
 0x203   : > { %v2047_v50 = vsel %vm783_vm3, %v2046_v7, %v2042_v42  ;;  %1789 = vadd.xlane.f32.xlu1 %v1547_v6  ;;  %1759 = vadd.xlane.f32.xlu0 %v1532_v23  ;;  %v2998_v6 = vld [vmem:[%s3360_s3 + $0x2c0] sm:$0xff]  ;;  %v1550_v42 = vmul.f32 %v2999_v41, %v2999_v41  ;;  %v3008_v41 = vld [vmem:[%s3360_s3 + $0x2d8] sm:$0xff] }
 0x204   : > { %v1608_v57 = vpop.xlane.xlu1 %1607  ;;  %v2052_v52 = vsel %vm790_vm4, %v2051_v21, %v2047_v50  ;;  %v1606_v55 = vpop.xlane.xlu0 %1605  ;;  %v1521_v40 = vmul.f32 %v2998_v6, %v2998_v6 }
 0x205   : > { %v2061_v9 = vrot.slane %v1608_v57, %v3526_v53  ;;  %v2056_v58 = vrot.slane %v1606_v55, %v3529_v54  ;;  %v3001_v57 = vld [vmem:[%s3360_s3 + $0x3b0] sm:$0xff] }
 0x207   : > { %v2057_v13 = vsel %vm797_vm5, %v2056_v58, %v2052_v52  ;;  %1761 = vadd.xlane.f32.xlu1 %v1533_v25  ;;  %1731 = vadd.xlane.f32.xlu0 %v1518_v48  ;;  %v3000_v25 = vld [vmem:[%s3360_s3 + $0x338] sm:$0xff]  ;;  %v1551_v52 = vmul.f32 %v3001_v57, %v3001_v57  ;;  %v3010_v57 = vld [vmem:[%s3360_s3 + $0x2e0] sm:$0xff] }
 0x208   : > { %v1612_v20 = vpop.xlane.xlu1 %1611  ;;  %v2062_v61 = vsel %vm804_vm6, %v2061_v9, %v2057_v13  ;;  %v1610_v12 = vpop.xlane.xlu0 %1609  ;;  %v1536_v50 = vmul.f32 %v3000_v25, %v3000_v25  ;;  %v3002_v13 = vld [vmem:[%s3360_s3 + $0x2c8] sm:$0xff] }
 0x209   : > { %v2071_v15 = vrot.slane %v1612_v20, %v3541_v14  ;;  %v2066_v10 = vrot.slane %v1610_v12, %v3547_v19  ;;  %v1522_v20 = vmul.f32 %v3002_v13, %v3002_v13 }
 0x20b   : > { %v2067_v2 = vsel %vm811_vm7, %v2066_v10, %v2062_v61  ;;  %1733 = vadd.xlane.f32.xlu1 %v1519_v60  ;;  %1791 = vadd.xlane.f32.xlu0 %v1548_v63  ;;  %v3003_v61 = vld [vmem:[%s3360_s3 + $0x340] sm:$0xff] }
 0x20c   : > { %v1616_v51 = vpop.xlane.xlu1 %1615  ;;  %v2072_v4 = vsel %vm818_vm8, %v2071_v15, %v2067_v2  ;;  %v1614_v24 = vpop.xlane.xlu0 %1613  ;;  %v1537_v12 = vmul.f32 %v3003_v61, %v3003_v61  ;;  %v3005_v2 = vld [vmem:[%s3360_s3 + $0x3b8] sm:$0xff] }
 0x20d   : > { %v2081_v26 = vrot.slane %v1616_v51, %v3559_v36  ;;  %v2076_v27 = vrot.slane %v1614_v24, %v3562_v37  ;;  %v1552_v51 = vmul.f32 %v3005_v2, %v3005_v2  ;;  %v3012_v61 = vld [vmem:[%s3360_s3 + $0x358] sm:$0xff] }
 0x20f   : > { %v2077_v5 = vsel %vm825_vm9, %v2076_v27, %v2072_v4  ;;  %1793 = vadd.xlane.f32.xlu1 %v1549_v11  ;;  %1763 = vadd.xlane.f32.xlu0 %v1534_v56  ;;  %v1523_v11 = vmul.f32 %v3004_v16, %v3004_v16 }
 0x210   : > { %v1620_v17 = vpop.xlane.xlu1 %1619  ;;  %v2082_v33 = vsel %vm4503_vm10, %v2081_v26, %v2077_v5  ;;  %v1618_v43 = vpop.xlane.xlu0 %1617  ;;  %vm4504_vm10 = vcmask 1041409   ;;  %v3007_v5 = vld [vmem:[%s3360_s3 + $0x3c0] sm:$0xff] }
 0x211   : > { %v2091_v23 = vrot.slane %v1620_v17, %v3569_v46  ;;  %v2086_v35 = vrot.slane %v1618_v43, %v3572_v47  ;;  %v1553_v17 = vmul.f32 %v3007_v5, %v3007_v5 }
 0x213   : > { %v2087_v38 = vsel %vm839_vm11, %v2086_v35, %v2082_v33  ;;  %1765 = vadd.xlane.f32.xlu1 %v1535_v3  ;;  %1735 = vadd.xlane.f32.xlu0 %v1520_v1  ;;  %v1538_v3 = vmul.f32 %v3006_v0, %v3006_v0 }
 0x214   : > { %v1624_v21 = vpop.xlane.xlu1 %1623  ;;  %v2092_v7 = vsel %vm846_vm12, %v2091_v23, %v2087_v38  ;;  %v1622_v8 = vpop.xlane.xlu0 %1621  ;;  %v3009_v38 = vld [vmem:[%s3360_s3 + $0x350] sm:$0xff] }
 0x215   : > { %v2101_v48 = vrot.slane %v1624_v21, %v3585_v18  ;;  %v2096_v49 = vrot.slane %v1622_v8, %v3588_v62  ;;  %v1539_v21 = vmul.f32 %v3009_v38, %v3009_v38 }
 0x217   : > { %v2097_v55 = vsel %vm853_vm13, %v2096_v49, %v2092_v7  ;;  %1737 = vadd.xlane.f32.xlu1 %v1521_v40  ;;  %1795 = vadd.xlane.f32.xlu0 %v1550_v42  ;;  %v1524_v42 = vmul.f32 %v3008_v41, %v3008_v41 }
 0x218   : > { %v2102_v9 = vsel %vm860_vm14, %v2101_v48, %v2097_v55  ;;  %v1628_v58 = vpop.xlane.xlu1 %1627  ;;  %v1626_v59 = vpop.xlane.xlu0 %1625  ;;  %v3011_v55 = vld [vmem:[%s3360_s3 + $0x3c8] sm:$0xff] }
 0x219   : > { %v4114_v60 = vsel %vm4504_vm10, %v2102_v9, %v4063_v22  ;;  %v2110_v44 = vrot.slane %v1628_v58, %v3501_v32  ;;  %v2106_v63 = vrot.slane %v1626_v59, %v3495_v30  ;;  %v1554_v9 = vmul.f32 %v3011_v55, %v3011_v55  ;;  %v3020_v55 = vld [vmem:[%s3360_s3 + $0x2f8] sm:$0xff] }
 0x21a   : > { %vm4505_vm10 = vcmask 786112  }
 0x21b   : > { %v2111_v15 = vsel %vm762_vm0, %v2110_v44, %v2106_v63  ;;  %1797 = vadd.xlane.f32.xlu1 %v1551_v52  ;;  %1767 = vadd.xlane.f32.xlu0 %v1536_v50  ;;  %v1525_v52 = vmul.f32 %v3010_v57, %v3010_v57 }
 0x21c   : > { %v1632_v10 = vpop.xlane.xlu1 %1631  ;;  %v1630_v29 = vpop.xlane.xlu0 %1629 }
 0x21d   : > { %v2120_v56 = vrot.slane %v1632_v10, %v3498_v31  ;;  %v2115_v22 = vrot.slane %v1630_v29, %v3505_v34 }
 0x21f   : > { %v2116_v4 = vsel %vm769_vm1, %v2115_v22, %v2111_v15  ;;  %1769 = vadd.xlane.f32.xlu1 %v1537_v12  ;;  %1739 = vadd.xlane.f32.xlu0 %v1522_v20  ;;  %v1540_v12 = vmul.f32 %v3012_v61, %v3012_v61  ;;  %v3013_v15 = vld [vmem:[%s3360_s3 + $0x3d0] sm:$0xff] }
 0x220   : > { %v1636_v24 = vpop.xlane.xlu1 %1635  ;;  %v2121_v26 = vsel %vm776_vm2, %v2120_v56, %v2116_v4  ;;  %v1634_v27 = vpop.xlane.xlu0 %1633  ;;  %v1555_v10 = vmul.f32 %v3013_v15, %v3013_v15  ;;  %v3022_v15 = vld [vmem:[%s3360_s3 + $0x378] sm:$0xff] }
 0x221   : > { %v2130_v28 = vrot.slane %v1636_v24, %v3510_v39  ;;  %v2125_v1 = vrot.slane %v1634_v27, %v3518_v45  ;;  %v3015_v24 = vld [vmem:[%s3360_s3 + $0x360] sm:$0xff] }
 0x223   : > { %v2126_v33 = vsel %vm783_vm3, %v2125_v1, %v2121_v26  ;;  %1741 = vadd.xlane.f32.xlu1 %v1523_v11  ;;  %1799 = vadd.xlane.f32.xlu0 %v1552_v51  ;;  %v3014_v51 = vld [vmem:[%s3360_s3 + $0x2e8] sm:$0xff]  ;;  %v1541_v26 = vmul.f32 %v3015_v24, %v3015_v24  ;;  %v3024_v24 = vld [vmem:[%s3360_s3 + $0x3f8] sm:$0xff] }
 0x224   : > { %v1640_v43 = vpop.xlane.xlu1 %1639  ;;  %v2131_v23 = vsel %vm790_vm4, %v2130_v28, %v2126_v33  ;;  %v1638_v35 = vpop.xlane.xlu0 %1637  ;;  %v1526_v4 = vmul.f32 %v3014_v51, %v3014_v51 }
 0x225   : > { %v2140_v6 = vrot.slane %v1640_v43, %v3526_v53  ;;  %v2135_v40 = vrot.slane %v1638_v35, %v3529_v54  ;;  %v3017_v43 = vld [vmem:[%s3360_s3 + $0x3d8] sm:$0xff] }
 0x227   : > { %v2136_v7 = vsel %vm797_vm5, %v2135_v40, %v2131_v23  ;;  %1801 = vadd.xlane.f32.xlu1 %v1553_v17  ;;  %1771 = vadd.xlane.f32.xlu0 %v1538_v3  ;;  %v3016_v17 = vld [vmem:[%s3360_s3 + $0x2f0] sm:$0xff]  ;;  %v1556_v23 = vmul.f32 %v3017_v43, %v3017_v43 }
 0x228   : > { %v1644_v8 = vpop.xlane.xlu1 %1643  ;;  %v2141_v48 = vsel %vm804_vm6, %v2140_v6, %v2136_v7  ;;  %v1642_v49 = vpop.xlane.xlu0 %1641  ;;  %v1527_v33 = vmul.f32 %v3016_v17, %v3016_v17  ;;  %v3018_v7 = vld [vmem:[%s3360_s3 + $0x368] sm:$0xff] }
 0x229   : > { %v2150_v25 = vrot.slane %v1644_v8, %v3541_v14  ;;  %v2145_v50 = vrot.slane %v1642_v49, %v3547_v19  ;;  %v1542_v8 = vmul.f32 %v3018_v7, %v3018_v7 }
 0x22b   : > { %v2146_v58 = vsel %vm811_vm7, %v2145_v50, %v2141_v48  ;;  %1773 = vadd.xlane.f32.xlu1 %v1539_v21  ;;  %1743 = vadd.xlane.f32.xlu0 %v1524_v42  ;;  %v3019_v48 = vld [vmem:[%s3360_s3 + $0x3e0] sm:$0xff] }
 0x22c   : > { %v1648_v59 = vpop.xlane.xlu1 %1647  ;;  %v2151_v44 = vsel %vm818_vm8, %v2150_v25, %v2146_v58  ;;  %v1646_v63 = vpop.xlane.xlu0 %1645  ;;  %v1557_v49 = vmul.f32 %v3019_v48, %v3019_v48  ;;  %v3021_v58 = vld [vmem:[%s3360_s3 + $0x370] sm:$0xff] }
 0x22d   : > { %v2160_v13 = vrot.slane %v1648_v59, %v3559_v36  ;;  %v2155_v20 = vrot.slane %v1646_v63, %v3562_v37  ;;  %v1543_v59 = vmul.f32 %v3021_v58, %v3021_v58 }
 0x22f   : > { %v2156_v29 = vsel %vm825_vm9, %v2155_v20, %v2151_v44  ;;  %1745 = vadd.xlane.f32.xlu1 %v1525_v52  ;;  %1803 = vadd.xlane.f32.xlu0 %v1554_v9  ;;  %v1528_v9 = vmul.f32 %v3020_v55, %v3020_v55 }
 0x230   : > { %v1652_v56 = vpop.xlane.xlu1 %1651  ;;  %v2161_v22 = vsel %vm4505_vm10, %v2160_v13, %v2156_v29  ;;  %v1650_v16 = vpop.xlane.xlu0 %1649  ;;  %vm4506_vm10 = vcmask 1042434   ;;  %v3023_v29 = vld [vmem:[%s3360_s3 + $0x3e8] sm:$0xff] }
 0x231   : > { %v2170_v11 = vrot.slane %v1652_v56, %v3569_v46  ;;  %v2165_v2 = vrot.slane %v1650_v16, %v3572_v47  ;;  %v1558_v56 = vmul.f32 %v3023_v29, %v3023_v29 }
 0x233   : > { %v2166_v27 = vsel %vm839_vm11, %v2165_v2, %v2161_v22  ;;  %1805 = vadd.xlane.f32.xlu1 %v1555_v10  ;;  %1775 = vadd.xlane.f32.xlu0 %v1540_v12  ;;  %v1544_v10 = vmul.f32 %v3022_v15, %v3022_v15 }
 0x234   : > { %v1656_v28 = vpop.xlane.xlu1 %1655  ;;  %v2171_v1 = vsel %vm846_vm12, %v2170_v11, %v2166_v27  ;;  %v1654_v0 = vpop.xlane.xlu0 %1653  ;;  %v3025_v27 = vld [vmem:[%s3360_s3 + $0x3f0] sm:$0xff] }
 0x235   : > { %v2180_v3 = vrot.slane %v1656_v28, %v3585_v18  ;;  %v2175_v5 = vrot.slane %v1654_v0, %v3588_v62  ;;  %v1559_v28 = vmul.f32 %v3025_v27, %v3025_v27 }
 0x237   : > { %v2176_v35 = vsel %vm853_vm13, %v2175_v5, %v2171_v1  ;;  %1777 = vadd.xlane.f32.xlu1 %v1541_v26  ;;  %1747 = vadd.xlane.f32.xlu0 %v1526_v4  ;;  %v1560_v26 = vmul.f32 %v3024_v24, %v3024_v24 }
 0x238   : > { %v2181_v6 = vsel %vm860_vm14, %v2180_v3, %v2176_v35  ;;  %v1660_v40 = vpop.xlane.xlu1 %1659  ;;  %v1658_v41 = vpop.xlane.xlu0 %1657 }
 0x239   : > { %v4165_v42 = vsel %vm4506_vm10, %v2181_v6, %v4114_v60  ;;  %v2189_v38 = vrot.slane %v1660_v40, %v3501_v32  ;;  %v2185_v21 = vrot.slane %v1658_v41, %v3495_v30  ;;  %vm4507_vm10 = vcmask 786112  }
 0x23b   : > { %v2190_v25 = vsel %vm762_vm0, %v2189_v38, %v2185_v21  ;;  %1749 = vadd.xlane.f32.xlu1 %v1527_v33  ;;  %1807 = vadd.xlane.f32.xlu0 %v1556_v23 }
 0x23c   : > { %v1664_v50 = vpop.xlane.xlu1 %1663  ;;  %v1662_v57 = vpop.xlane.xlu0 %1661 }
 0x23d   : > { %v2199_v52 = vrot.slane %v1664_v50, %v3498_v31  ;;  %v2194_v60 = vrot.slane %v1662_v57, %v3505_v34 }
 0x23f   : > { %v2195_v44 = vsel %vm769_vm1, %v2194_v60, %v2190_v25  ;;  %1809 = vadd.xlane.f32.xlu1 %v1557_v49  ;;  %1779 = vadd.xlane.f32.xlu0 %v1542_v8 }
 0x240   : > { %v1668_v63 = vpop.xlane.xlu1 %1667  ;;  %v2200_v13 = vsel %vm776_vm2, %v2199_v52, %v2195_v44  ;;  %v1666_v20 = vpop.xlane.xlu0 %1665 }
 0x241   : > { %v2209_v61 = vrot.slane %v1668_v63, %v3510_v39  ;;  %v2204_v12 = vrot.slane %v1666_v20, %v3518_v45 }
 0x243   : > { %v2205_v22 = vsel %vm783_vm3, %v2204_v12, %v2200_v13  ;;  %1781 = vadd.xlane.f32.xlu1 %v1543_v59  ;;  %1751 = vadd.xlane.f32.xlu0 %v1528_v9 }
 0x244   : > { %v1672_v16 = vpop.xlane.xlu1 %1671  ;;  %v2210_v11 = vsel %vm790_vm4, %v2209_v61, %v2205_v22  ;;  %v1670_v2 = vpop.xlane.xlu0 %1669 }
 0x245   : > { %v2219_v51 = vrot.slane %v1672_v16, %v3526_v53  ;;  %v2214_v4 = vrot.slane %v1670_v2, %v3529_v54 }
 0x247   : > { %v2215_v1 = vsel %vm797_vm5, %v2214_v4, %v2210_v11  ;;  %1783 = vadd.xlane.f32.xlu1 %v1544_v10  ;;  %1811 = vadd.xlane.f32.xlu0 %v1558_v56 }
 0x248   : > { %v1676_v0 = vpop.xlane.xlu1 %1675  ;;  %v2220_v3 = vsel %vm804_vm6, %v2219_v51, %v2215_v1  ;;  %v1674_v5 = vpop.xlane.xlu0 %1673 }
 0x249   : > { %v2229_v17 = vrot.slane %v1676_v0, %v3541_v14  ;;  %v2224_v33 = vrot.slane %v1674_v5, %v3547_v19 }
 0x24b   : > { %v2225_v43 = vsel %vm811_vm7, %v2224_v33, %v2220_v3  ;;  %1813 = vadd.xlane.f32.xlu0 %v1559_v28  ;;  %1815 = vadd.xlane.f32.xlu1 %v1560_v26 }
 0x24c   : > { %v1680_v23 = vpop.xlane.xlu1 %1679  ;;  %v2230_v35 = vsel %vm818_vm8, %v2229_v17, %v2225_v43  ;;  %v1678_v6 = vpop.xlane.xlu0 %1677 }
 0x24d   : > { %v2239_v40 = vrot.slane %v1680_v23, %v3559_v36  ;;  %v2234_v41 = vrot.slane %v1678_v6, %v3562_v37 }
 0x24f   : > { %v2235_v38 = vsel %vm825_vm9, %v2234_v41, %v2230_v35 }
 0x250   : > { %v1684_v21 = vpop.xlane.xlu1 %1683  ;;  %v2240_v7 = vsel %vm4507_vm10, %v2239_v40, %v2235_v38  ;;  %v1682_v8 = vpop.xlane.xlu0 %1681  ;;  %vm4508_vm10 = vcmask 1043459  }
 0x251   : > { %v2249_v48 = vrot.slane %v1684_v21, %v3569_v46  ;;  %v2244_v49 = vrot.slane %v1682_v8, %v3572_v47 }
 0x253   : > { %v2245_v25 = vsel %vm839_vm11, %v2244_v49, %v2240_v7 }
 0x254   : > { %v1688_v50 = vpop.xlane.xlu1 %1687  ;;  %v2250_v57 = vsel %vm846_vm12, %v2249_v48, %v2245_v25  ;;  %v1686_v52 = vpop.xlane.xlu0 %1685 }
 0x255   : > { %v2259_v60 = vrot.slane %v1688_v50, %v3585_v18  ;;  %v2254_v55 = vrot.slane %v1686_v52, %v3588_v62 }
 0x257   : > { %v2255_v9 = vsel %vm853_vm13, %v2254_v55, %v2250_v57 }
 0x258   : > { %v2260_v58 = vsel %vm860_vm14, %v2259_v60, %v2255_v9  ;;  %v1692_v59 = vpop.xlane.xlu1 %1691  ;;  %v1690_v44 = vpop.xlane.xlu0 %1689 }
 0x259   : > { %v4209_v63 = vsel %vm4508_vm10, %v2260_v58, %v4165_v42  ;;  %v2268_v13 = vrot.slane %v1692_v59, %v3501_v32  ;;  %v2264_v20 = vrot.slane %v1690_v44, %v3495_v30 }
 0x25b   : > { %v2269_v61 = vsel %vm762_vm0, %v2268_v13, %v2264_v20 }
 0x25c   : > { %v1696_v42 = vpop.xlane.xlu1 %1695  ;;  %v1694_v12 = vpop.xlane.xlu0 %1693 }
 0x25d   : > { %3039 = shalt.err (!%p3036_p1)
}
 0x25e   : > { %s3040_s19 = scalar_lea.hbm %s2606_s7, 128  ;;  %s3044_s3 = scalar_lea.hbm %s4476_s1, 512 }
 0x25f   : > { %p3041_p3 = scmp.ne.s32.totalorder %s2606_s7, %s3040_s19  ;;  %p3045_p8 = scmp.lt.s32.totalorder %s2606_s7, %s4476_s1 }
 0x260   : > { %p3046_p5 = scmp.lt.s32.totalorder %s3044_s3, %s3040_s19 }
 0x261   : > { %p3042_p4 = pnand %p3041_p3, %p3314_p11 }
 0x262   : > { %p3047_p7 = por %p3046_p5, %p3045_p8 }
 0x263   : > { %p3043_p6 = pneg %p3042_p4 }
 0x265   : > { %p3048_p9 = pnand %p3047_p7, %p3043_p6 }
 0x267   : > { %3051 = shalt.err (!%p3048_p9)
}
 0x268   : > { %2786 = dma.vmem_to_hbm [thread:$0]  (%p3314_p11), %s4218_s8, 128, %s2606_s7, %s2588_s16   ;;  %v2278_v15 = vrot.slane %v1696_v42, %v3498_v31  ;;  %v2273_v10 = vrot.slane %v1694_v12, %v3505_v34  ;;  %v1700_v56 = vpop.xlane.xlu1 %1699  ;;  %v1698_v16 = vpop.xlane.xlu0 %1697  ;;  %vm4509_vm10 = vcmask 786112  }
 0x269   : > { %v2288_v11 = vrot.slane %v1700_v56, %v3510_v39  ;;  %v2283_v2 = vrot.slane %v1698_v16, %v3518_v45  ;;  %s2623_s15 = sshll.u32 %s3372_s23, 4  ;;  %s2621_s6 = scalar_lea.hbm %s4477_s2, %s2770_s5  ;;  %s2624_s15 = int_to_ptr.vmem [resolvable:$true] %s2623_s15 }
 0x26a   : > { %v2274_v29 = vsel %vm769_vm1, %v2273_v10, %v2269_v61  ;;  %s2593_s7 = scalar_lea.sflag [#allocation7], %s3367_s20  ;;  %s3052_s16 = scalar_lea.vmem %s2624_s15, 128 }
 0x26b   : > { %v2279_v22 = vsel %vm776_vm2, %v2278_v15, %v2274_v29  ;;  %p3053_p10 = scmp.ne.s32.totalorder %s2624_s15, %s3052_s16  ;;  %s3203_s24 = smov [#allocation6]  }
 0x26c   : > { %v2284_v51 = vsel %vm783_vm3, %v2283_v2, %v2279_v22  ;;  %v1704_v4 = vpop.xlane.xlu1 %1703  ;;  %v1702_v26 = vpop.xlane.xlu0 %1701  ;;  %s3056_s25 = sshll.u32 %s3203_s24, 4  ;;  %s3057_s25 = int_to_ptr.vmem [resolvable:$false] %s3056_s25 }
 0x26d   : > { %v2289_v24 = vsel %vm790_vm4, %v2288_v11, %v2284_v51  ;;  %v2298_v27 = vrot.slane %v1704_v4, %v3526_v53  ;;  %v2293_v28 = vrot.slane %v1702_v26, %v3529_v54  ;;  %p3054_p12 = pnand %p3053_p10, %p3314_p11  ;;  %s3058_s27 = scalar_lea.vmem %s3057_s25, 256 }
 0x26e   : > { %p3059_p0 = scmp.lt.s32.totalorder %s2624_s15, %s3057_s25  ;;  %p3060_p1 = scmp.lt.s32.totalorder %s3058_s27, %s3052_s16 }
 0x26f   : > { %v2294_v1 = vsel %vm797_vm5, %v2293_v28, %v2289_v24  ;;  %p3055_p13 = pneg %p3054_p12 }
 0x270   : > { %v1708_v0 = vpop.xlane.xlu1 %1707  ;;  %v2299_v3 = vsel %vm804_vm6, %v2298_v27, %v2294_v1  ;;  %v1706_v5 = vpop.xlane.xlu0 %1705  ;;  %p3061_p3 = por %p3060_p1, %p3059_p0 }
 0x271   : > { %v2308_v17 = vrot.slane %v1708_v0, %v3541_v14  ;;  %v2303_v33 = vrot.slane %v1706_v5, %v3547_v19 }
 0x272   : > { %p3062_p4 = pnand %p3061_p3, %p3055_p13 }
 0x273   : > { %v2304_v43 = vsel %vm811_vm7, %v2303_v33, %v2299_v3 }
 0x274   : > { %v1712_v23 = vpop.xlane.xlu1 %1711  ;;  %v2309_v35 = vsel %vm818_vm8, %v2308_v17, %v2304_v43  ;;  %v1710_v6 = vpop.xlane.xlu0 %1709 }
 0x275   : > { %v2318_v40 = vrot.slane %v1712_v23, %v3559_v36  ;;  %v2313_v41 = vrot.slane %v1710_v6, %v3562_v37 }
 0x277   : > { %v2314_v38 = vsel %vm825_vm9, %v2313_v41, %v2309_v35 }
 0x278   : > { %v1716_v21 = vpop.xlane.xlu1 %1715  ;;  %v2319_v7 = vsel %vm4509_vm10, %v2318_v40, %v2314_v38  ;;  %v1714_v8 = vpop.xlane.xlu0 %1713  ;;  %vm4510_vm10 = vcmask 1044484  }
 0x279   : > { %v2328_v48 = vrot.slane %v1716_v21, %v3569_v46  ;;  %v2323_v49 = vrot.slane %v1714_v8, %v3572_v47 }
 0x27b   : > { %v2324_v25 = vsel %vm839_vm11, %v2323_v49, %v2319_v7 }
 0x27c   : > { %v1720_v50 = vpop.xlane.xlu1 %1719  ;;  %v2329_v57 = vsel %vm846_vm12, %v2328_v48, %v2324_v25  ;;  %v1718_v52 = vpop.xlane.xlu0 %1717 }
 0x27d   : > { %v2338_v60 = vrot.slane %v1720_v50, %v3585_v18  ;;  %v2333_v55 = vrot.slane %v1718_v52, %v3588_v62 }
 0x27f   : > { %v2334_v9 = vsel %vm853_vm13, %v2333_v55, %v2329_v57 }
 0x280   : > { %v2339_v58 = vsel %vm860_vm14, %v2338_v60, %v2334_v9  ;;  %v1724_v59 = vpop.xlane.xlu1 %1723  ;;  %v1722_v44 = vpop.xlane.xlu0 %1721 }
 0x281   : > { %v2347_v13 = vrot.slane %v1724_v59, %v3501_v32  ;;  %v2343_v20 = vrot.slane %v1722_v44, %v3495_v30  ;;  %v4275_v61 = vsel %vm4510_vm10, %v2339_v58, %v4209_v63 }
 0x283   : > { %v2348_v42 = vsel %vm762_vm0, %v2347_v13, %v2343_v20 }
 0x284   : > { %v1754_v12 = vpop.xlane.xlu1 %1753  ;;  %v1726_v15 = vpop.xlane.xlu0 %1725 }
 0x285   : > { %v2352_v10 = vrot.slane %v1726_v15, %v3505_v34  ;;  %v2422_v16 = vrot.slane %v1754_v12, %v3495_v30 }
 0x287   : > { %v2353_v29 = vsel %vm769_vm1, %v2352_v10, %v2348_v42 }
 0x288   : > { %v1728_v56 = vpop.xlane.xlu1 %1727  ;;  %v1756_v22 = vpop.xlane.xlu0 %1755 }
 0x289   : > { %v2357_v11 = vrot.slane %v1728_v56, %v3498_v31  ;;  %v2426_v2 = vrot.slane %v1756_v22, %v3501_v32 }
 0x28b   : > { %v2358_v51 = vsel %vm776_vm2, %v2357_v11, %v2353_v29  ;;  %v2427_v63 = vsel %vm762_vm0, %v2426_v2, %v2422_v16 }
 0x28c   : > { %v1786_v4 = vpop.xlane.xlu1 %1785  ;;  %v1758_v24 = vpop.xlane.xlu0 %1757 }
 0x28d   : > { %v2431_v26 = vrot.slane %v1758_v24, %v3505_v34  ;;  %v2501_v42 = vrot.slane %v1786_v4, %v3495_v30 }
 0x28f   : > { %v2432_v27 = vsel %vm769_vm1, %v2431_v26, %v2427_v63 }
 0x290   : > { %v1730_v28 = vpop.xlane.xlu1 %1729  ;;  %v1788_v1 = vpop.xlane.xlu0 %1787 }
 0x291   : > { %v2505_v44 = vrot.slane %v1788_v1, %v3501_v32  ;;  %v2362_v13 = vrot.slane %v1730_v28, %v3518_v45 }
 0x293   : > { %v2506_v22 = vsel %vm762_vm0, %v2505_v44, %v2501_v42  ;;  %v2363_v11 = vsel %vm783_vm3, %v2362_v13, %v2358_v51  ;;  %vm4511_vm0 = vcmask 786112  }
 0x294   : > { %v1790_v0 = vpop.xlane.xlu1 %1789  ;;  %v1760_v3 = vpop.xlane.xlu0 %1759 }
 0x295   : > { %v2510_v20 = vrot.slane %v1790_v0, %v3505_v34  ;;  %v2436_v12 = vrot.slane %v1760_v3, %v3498_v31 }
 0x297   : > { %v2511_v34 = vsel %vm769_vm1, %v2510_v20, %v2506_v22  ;;  %v2437_v63 = vsel %vm776_vm2, %v2436_v12, %v2432_v27  ;;  %vm4512_vm1 = vmmov %vm4511_vm0 }
 0x298   : > { %v1762_v5 = vpop.xlane.xlu1 %1761  ;;  %v1732_v17 = vpop.xlane.xlu0 %1731 }
 0x299   : > { %v2441_v29 = vrot.slane %v1762_v5, %v3518_v45  ;;  %v2367_v56 = vrot.slane %v1732_v17, %v3510_v39 }
 0x29b   : > { %v2368_v51 = vsel %vm790_vm4, %v2367_v56, %v2363_v11 }
 0x29c   : > { %v1734_v33 = vpop.xlane.xlu1 %1733  ;;  %v1792_v43 = vpop.xlane.xlu0 %1791 }
 0x29d   : > { %v2372_v16 = vrot.slane %v1734_v33, %v3529_v54  ;;  %v2515_v32 = vrot.slane %v1792_v43, %v3498_v31  ;;  %v2442_v31 = vsel %vm783_vm3, %v2441_v29, %v2437_v63 }
 0x29f   : > { %v2373_v5 = vsel %vm797_vm5, %v2372_v16, %v2368_v51  ;;  %v2516_v27 = vsel %vm776_vm2, %v2515_v32, %v2511_v34  ;;  %vm4513_vm2 = vcmask 1045509  }
 0x2a0   : > { %v1794_v23 = vpop.xlane.xlu1 %1793  ;;  %v1764_v35 = vpop.xlane.xlu0 %1763 }
 0x2a1   : > { %v2446_v30 = vrot.slane %v1764_v35, %v3510_v39  ;;  %v2520_v4 = vrot.slane %v1794_v23, %v3518_v45 }
 0x2a3   : > { %v2447_v33 = vsel %vm790_vm4, %v2446_v30, %v2442_v31 }
 0x2a4   : > { %v1766_v6 = vpop.xlane.xlu1 %1765  ;;  %v1736_v40 = vpop.xlane.xlu0 %1735 }
 0x2a5   : > { %v2377_v2 = vrot.slane %v1736_v40, %v3526_v53  ;;  %v2451_v24 = vrot.slane %v1766_v6, %v3529_v54 }
 0x2a7   : > { %v2378_v43 = vsel %vm804_vm6, %v2377_v2, %v2373_v5  ;;  %v2452_v6 = vsel %vm797_vm5, %v2451_v24, %v2447_v33 }
 0x2a8   : > { %v1738_v41 = vpop.xlane.xlu1 %1737  ;;  %v1796_v38 = vpop.xlane.xlu0 %1795 }
 0x2a9   : > { %v2382_v26 = vrot.slane %v1738_v41, %v3547_v19  ;;  %v2525_v0 = vrot.slane %v1796_v38, %v3510_v39  ;;  %v2521_v39 = vsel %vm783_vm3, %v2520_v4, %v2516_v27  ;;  %vm4514_vm3 = vmmov %vm4511_vm0 }
 0x2ab   : > { %v2383_v40 = vsel %vm811_vm7, %v2382_v26, %v2378_v43 }
 0x2ac   : > { %v4287_v21 = vpop.xlane.xlu1 %1797  ;;  %v1768_v7 = vpop.xlane.xlu0 %1767 }
 0x2ad   : > { %v2456_v45 = vrot.slane %v1768_v7, %v3526_v53  ;;  %v2530_v42 = vrot.slane %v4287_v21, %v3529_v54 }
 0x2b0   : > { %v4289_v8 = vpop.xlane.xlu1 %1769  ;;  %v1740_v48 = vpop.xlane.xlu0 %1739 }
 0x2b1   : > { %v2387_v3 = vrot.slane %v1740_v48, %v3541_v14  ;;  %v2461_v23 = vrot.slane %v4289_v8, %v3547_v19  ;;  %v2526_v48 = vsel %vm790_vm4, %v2525_v0, %v2521_v39  ;;  %vm4515_vm4 = vcmask 1047559  }
 0x2b4   : > { %v1742_v49 = vpop.xlane.xlu1 %1741  ;;  %v4291_v25 = vpop.xlane.xlu0 %1799 }
 0x2b5   : > { %v2392_v17 = vrot.slane %v1742_v49, %v3562_v37  ;;  %v2388_v49 = vsel %vm818_vm8, %v2387_v3, %v2383_v40 }
 0x2b7   : > { %v2393_v13 = vsel %vm825_vm9, %v2392_v17, %v2388_v49 }
 0x2b8   : > { %v4293_v50 = vpop.xlane.xlu1 %1801  ;;  %v4295_v57 = vpop.xlane.xlu0 %1771 }
 0x2b9   : > { %v2466_v44 = vrot.slane %v4295_v57, %v3541_v14  ;;  %v2540_v56 = vrot.slane %v4293_v50, %v3547_v19 }
 0x2bc   : > { %v4297_v52 = vpop.xlane.xlu1 %1773  ;;  %v1744_v60 = vpop.xlane.xlu0 %1743 }
 0x2bd   : > { %v2397_v35 = vrot.slane %v1744_v60, %v3559_v36  ;;  %v2457_v60 = vsel %vm804_vm6, %v2456_v45, %v2452_v6  ;;  %v2471_v20 = vrot.slane %v4297_v52, %v3562_v37 }
 0x2be   : > { %v2462_v12 = vsel %vm811_vm7, %v2461_v23, %v2457_v60  ;;  %v1432_v23 = vld [vmem:[%s3372_s23] sm:$0xff] }
 0x2bf   : > { %v2398_v29 = vsel %vm4511_vm0, %v2397_v35, %v2393_v13  ;;  %v2467_v21 = vsel %vm818_vm8, %v2466_v44, %v2462_v12 }
 0x2c0   : > { %v1746_v55 = vpop.xlane.xlu1 %1745  ;;  %v4299_v9 = vpop.xlane.xlu0 %1803 }
 0x2c1   : > { %v2402_v41 = vrot.slane %v1746_v55, %v3572_v47  ;;  %v2545_v19 = vrot.slane %v4299_v9, %v3541_v14 }
 0x2c3   : > { %v2403_v52 = vsel %vm839_vm11, %v2402_v41, %v2398_v29 }
 0x2c4   : > { %v4301_v58 = vpop.xlane.xlu1 %1805  ;;  %v4303_v59 = vpop.xlane.xlu0 %1775 }
 0x2c5   : > { %v2476_v57 = vrot.slane %v4303_v59, %v3559_v36  ;;  %v2550_v34 = vrot.slane %v4301_v58, %v3562_v37 }
 0x2c8   : > { %v4310_v15 = vpop.xlane.xlu1 %1777  ;;  %v1748_v10 = vpop.xlane.xlu0 %1747 }
 0x2c9   : > { %v2407_v8 = vrot.slane %v1748_v10, %v3569_v46  ;;  %v2535_v10 = vrot.slane %v4291_v25, %v3526_v53  ;;  %v2481_v22 = vrot.slane %v4310_v15, %v3572_v47  ;;  %v2472_v53 = vsel %vm825_vm9, %v2471_v20, %v2467_v21 }
 0x2ca   : > { %v2531_v15 = vsel %vm797_vm5, %v2530_v42, %v2526_v48  ;;  %v2477_v30 = vsel %vm4512_vm1, %v2476_v57, %v2472_v53 }
 0x2cb   : > { %v2408_v32 = vsel %vm846_vm12, %v2407_v8, %v2403_v52  ;;  %v2536_v63 = vsel %vm804_vm6, %v2535_v10, %v2531_v15  ;;  %v2482_v4 = vsel %vm839_vm11, %v2481_v22, %v2477_v30 }
 0x2cc   : > { %v1750_v28 = vpop.xlane.xlu1 %1749  ;;  %v4325_v1 = vpop.xlane.xlu0 %1807 }
 0x2cd   : > { %v2412_v55 = vrot.slane %v1750_v28, %v3588_v62  ;;  %v2555_v14 = vrot.slane %v4325_v1, %v3559_v36  ;;  %v2541_v28 = vsel %vm811_vm7, %v2540_v56, %v2536_v63 }
 0x2ce   : > { %v2546_v51 = vsel %vm818_vm8, %v2545_v19, %v2541_v28 }
 0x2cf   : > { %v2413_v25 = vsel %vm853_vm13, %v2412_v55, %v2408_v32 }
 0x2d0   : > { %v1810_v38 = vpop.xlane.xlu1 %1809  ;;  %v1780_v7 = vpop.xlane.xlu0 %1779 }
 0x2d1   : > { %v2486_v11 = vrot.slane %v1780_v7, %v3569_v46  ;;  %v2560_v37 = vrot.slane %v1810_v38, %v3572_v47 }
 0x2d3   : > { %v2487_v58 = vsel %vm846_vm12, %v2486_v11, %v2482_v4 }
 0x2d4   : > { %v1782_v16 = vpop.xlane.xlu1 %1781  ;;  %v1752_v54 = vpop.xlane.xlu0 %1751 }
 0x2d5   : > { %v2417_v59 = vrot.slane %v1752_v54, %v3585_v18  ;;  %v2491_v50 = vrot.slane %v1782_v16, %v3588_v62 }
 0x2d7   : > { %v2418_v2 = vsel %vm860_vm14, %v2417_v59, %v2413_v25  ;;  %v2492_v0 = vsel %vm853_vm13, %v2491_v50, %v2487_v58 }
 0x2d8   : > { %v2581_v9 = vsel %vm4513_vm2, %v2418_v2, %v4275_v61  ;;  %v1784_v24 = vpop.xlane.xlu1 %1783  ;;  %v1812_v26 = vpop.xlane.xlu0 %1811  ;;  %v2551_v61 = vsel %vm825_vm9, %v2550_v34, %v2546_v51 }
 0x2d9   : > { %v2496_v31 = vrot.slane %v1784_v24, %v3585_v18  ;;  %v2565_v36 = vrot.slane %v1812_v26, %v3569_v46  ;;  %v2556_v3 = vsel %vm4514_vm3, %v2555_v14, %v2551_v61 }
 0x2da   : > { %v2561_v45 = vsel %vm839_vm11, %v2560_v37, %v2556_v3 }
 0x2db   : > { %v2497_v1 = vsel %vm860_vm14, %v2496_v31, %v2492_v0  ;;  %v2566_v33 = vsel %vm846_vm12, %v2565_v36, %v2561_v45 }
 0x2dc   : > { %v2582_v47 = vsel %vm1425_vm15, %v2497_v1, %v2581_v9  ;;  %v1814_v5 = vpop.xlane.xlu0 %1813  ;;  %v1816_v27 = vpop.xlane.xlu1 %1815 }
 0x2dd   : > { %v2570_v17 = vrot.slane %v1814_v5, %v3588_v62  ;;  %v2575_v46 = vrot.slane %v1816_v27, %v3585_v18 }
 0x2df   : > { %v2571_v43 = vsel %vm853_vm13, %v2570_v17, %v2566_v33 }
 0x2e0   : > { %v2576_v35 = vsel %vm860_vm14, %v2575_v46, %v2571_v43 }
 0x2e1   : > { %v2583_v39 = vsel %vm4515_vm4, %v2576_v35, %v2582_v47 }
 0x2e2   : > { %v2585_v6 = vadd.f32 %v2583_v39, %v1432_v23 }
 0x2e4   : > { %2586 = vst [vmem:[%s3372_s23] sm:$0xff] %v2585_v6 }
 0x2e5   : > { %3065 = shalt.err (!%p3062_p4)
}
 0x2e6   : > { %s3066_s30 = scalar_lea.hbm %s2621_s6, 128  ;;  %s3070_s5 = scalar_lea.hbm %s4477_s2, 512 }
 0x2e7   : > { %p3067_p6 = scmp.ne.s32.totalorder %s2621_s6, %s3066_s30  ;;  %p3071_p7 = scmp.lt.s32.totalorder %s2621_s6, %s4477_s2 }
 0x2e8   : > { %p3072_p9 = scmp.lt.s32.totalorder %s3070_s5, %s3066_s30 }
 0x2e9   : > { %p3068_p8 = pnand %p3067_p6, %p3314_p11 }
 0x2ea   : > { %p3073_p10 = por %p3072_p9, %p3071_p7 }
 0x2eb   : > { %p3069_p5 = pneg %p3068_p8 }
 0x2ed   : > { %p3074_p12 = pnand %p3073_p10, %p3069_p5 }
 0x2ef   : > { %3077 = shalt.err (!%p3074_p12)
}
 0x2f0   : > { %2787 = dma.vmem_to_hbm [thread:$0]  (%p3314_p11), %s2624_s15, 128, %s2621_s6, %s2593_s7  }
 0x2f1 PF: > { %p2797_p13 = scmp.ge.s32.totalorder %s3192_s21, 2  ;;  %s2635_s26 = sand.u32 1, %s3144_s9  }
 0x2f2   : > { %s2636_s29 = scalar_lea.sflag [#allocation4], %s2635_s26 }
 0x2f3   : > { %p2791_p0 = pnand %p2797_p13, %p3323_p2 }
 0x2f5   : > { %p2792_p1 = pneg %p2791_p0 }
 0x2f7   : > { %3135 = dma.done.wait (%p2792_p1), %s2636_s29, 128  }
 0x2f8   : > { %3137 = vsyncadd (%p2792_p1), %s2636_s29, 4294967168  ;;  %s2645_s3 = scalar_lea.sflag [#allocation7], %s2635_s26 }
 0x2f9   : > { %3139 = dma.done.wait (%p2792_p1), %s2645_s3, 128  }
 0x2fa   : > { %3141 = vsyncadd (%p2792_p1), %s2645_s3, 4294967168  ;;  %s22_s21 = sadd.s32 1, %s3192_s21   ;;  %s4517_s28 = sld [smem:[#allocation14_spill]] }
 0x2fb   : > { %p4431_p3 = scmp.ge.s32.totalorder %s22_s21, 10   ;;  %s4518_s11 = sld [smem:[#allocation20_spill]] }
 0x2fc   : > { %s4519_s22 = sld [smem:[#allocation21_spill]]  ;;  %s4525_s9 = smov %s3148_s10 }
 0x2fd   : > { %s4520_s16 = sld [smem:[#allocation15_spill]]  ;;  %s4527_s12 = smov %s3160_s13 }
 0x2fe   : > { %s4521_s17 = sld [smem:[#allocation16_spill]]  ;;  %s4528_s13 = smov %s3164_s14 }
 0x2ff   : > { %s4522_s8 = sld [smem:[#allocation17_spill]]  ;;  %s4530_s15 = smov %s3180_s18 }
 0x300   : > { %s4523_s19 = sld [smem:[#allocation18_spill]]  ;;  %s4526_s10 = smov %s4517_s28 }
 0x301   : > { %s4524_s20 = sld [smem:[#allocation19_spill]]  ;;  %21 = sbr.rel (!%p4431_p3) target bundleno = 12 (0xc), region = 95 }
 0x302   : > { %s4529_s14 = smov %s4519_s22 }
 0x305   : > { %s4531_s18 = smov %s4522_s8 }
 0x306   :  { %2650 = vsyncpa [#allocation3], 1 }
 0x307   :  { %2652 = vsyncpa [#allocation3 + $0x1], 1 }
 0x308   :  { %2653 = vsyncpa [#allocation4], 1 }
 0x309   :  { %2655 = vsyncpa [#allocation4 + $0x1], 1 }
 0x30a   :  { %2656 = vsyncpa [#allocation7], 1 }
 0x30b   :  { %2658 = vsyncpa [#allocation7 + $0x1], 1 }

</bundles_post_ra>
